<compile_context>
chip_gen: v5e
topology: v5e:2x2
jax: 0.10.0
libtpu: 0.0.40
codegen_flags: <defaults>
</compile_context>

<pallas_src>
import jax
import jax.numpy as jnp
from jax import lax
from jax.experimental import pallas as pl
from jax.experimental.pallas import tpu as pltpu


def _feature_crossing_kernel(
    gamma_ref,                                    # SMEM scalar (1,)
    x0_ref, xr_ref,                               # per-block data (1,BN,SK)/(1,BR,SK)
    wx0_big_ref, whi_big_ref, wqt_ref, wkt_ref,   # weight constants
    bias_ref, en_ref, er_ref, wp_big_ref,         # structure constants
    hi_ref, attn_ref,
):
    f32 = jnp.float32
    x0_all = x0_ref[0]                                      # (BN, SK)
    xr_all = xr_ref[0]                                      # (BR, SK)

    # ---- confuse_hi / confuse_x0 (1x1 conv over the seq channel), folded into
    #      (SK, K) weight matrices -> one MXU matmul each for the whole block.
    xf = jnp.dot(x0_all, wx0_big_ref[...], preferred_element_type=f32)   # (BN, K)
    hf = jnp.dot(xr_all, whi_big_ref[...], preferred_element_type=f32)   # (BR, K)

    # ---- query / key projections.
    q = jnp.dot(xf, wqt_ref[...], preferred_element_type=f32)            # (BN, H)
    k = jnp.dot(hf, wkt_ref[...], preferred_element_type=f32)            # (BR, H)

    # ---- energies for all (row-batch, col-batch) pairs in one matmul; the
    #      off-own-batch entries are killed by a precomputed additive bias.
    energy = lax.dot_general(q, k, (((1,), (1,)), ((), ())),
                             preferred_element_type=f32)                 # (BN, BR)
    energy = energy + bias_ref[...]

    # ---- softmax over the rf own-batch columns (biased entries exp to 0).
    m = jnp.max(energy, axis=-1, keepdims=True)
    e = jnp.exp(energy - m)
    att = e / jnp.sum(e, axis=-1, keepdims=True)                         # (BN, BR)
    # TODO(synk): nn.Dropout(0.1) on the attention is eval-mode identity; not modelled.

    # ---- compact own-batch attention as a (BC, 1) column:
    #      att_col[(b,n,r)] = att[(b,n),(b,r)]
    tmp = jnp.dot(en_ref[...], att, preferred_element_type=f32)          # (BC, BR)
    att_col = jnp.sum(tmp * er_ref[...], axis=-1, keepdims=True)         # (BC, 1)
    attn_ref[0] = att_col

    scale = 1.0 + gamma_ref[0] * att_col                                 # (BC, 1)

    # ---- value = x0 (x) xr expanded to the (b, n, r) channels, scaled by the
    #      attention, then the pfs 1x1 conv.  Fully fused over (s, k) in the
    #      lane dimension: 3 matmuls and a single store per block.
    x0e = jnp.dot(en_ref[...], x0_all, preferred_element_type=f32)       # (BC, SK)
    xre = jnp.dot(er_ref[...], xr_all, preferred_element_type=f32)       # (BC, SK)
    vs = x0e * xre * scale
    hi_ref[0] = jnp.dot(wp_big_ref[...], vs, preferred_element_type=f32) # (BO, SK)


def _pick_b_blk(B):
    # Prefer a block size that divides B (no padding copy), keeps n_blk >= 2
    # (v7x has two TensorCores) and is <= 64 (kron constants scale as b_blk^2).
    for cand in (64, 32, 16, 8, 4, 2):
        if B % cand == 0 and B // cand >= 2:
            return cand
    return B


def feature_crossing(xr, x0, params, *, b_blk=None):
    """Returns (hi, attention, pfs_weight) like FeatureCrossing.forward (eval mode)."""
    B, S, rf, K = xr.shape
    nf = x0.shape[2]
    H = K // 2
    C = nf * rf
    w_pfs4 = params["w_pfs"]                          # (nr1, nf*rf, 1, 1)
    nr1 = w_pfs4.shape[0]

    if b_blk is None:
        b_blk = _pick_b_blk(B)
    n_blk = pl.cdiv(B, b_blk)
    b_pad = n_blk * b_blk
    if b_pad != B:   # fallback only; the default b_blk picker avoids padding
        pad = ((0, b_pad - B), (0, 0), (0, 0), (0, 0))
        xr_p, x0_p = jnp.pad(xr, pad), jnp.pad(x0, pad)
    else:
        xr_p, x0_p = xr, x0

    SK = S * K
    BN, BR, BC, BO = b_blk * nf, b_blk * rf, b_blk * C, b_blk * nr1

    # --- single layout: rows = (batch-in-block, feature), lanes = (s, k).
    xr_all = jnp.transpose(xr_p.reshape(n_blk, b_blk, S, rf, K),
                           (0, 1, 3, 2, 4)).reshape(n_blk, BR, SK).astype(jnp.float32)
    x0_all = jnp.transpose(x0_p.reshape(n_blk, b_blk, S, nf, K),
                           (0, 1, 3, 2, 4)).reshape(n_blk, BN, SK).astype(jnp.float32)

    # --- weights
    w_hi = params["w_confuse_hi"].reshape(S, 1).astype(jnp.float32)
    w_x0 = params["w_confuse_x0"].reshape(S, 1).astype(jnp.float32)
    eye_k = jnp.eye(K, dtype=jnp.float32)
    whi_big = jnp.kron(w_hi, eye_k)                                  # (SK, K)
    wx0_big = jnp.kron(w_x0, eye_k)                                  # (SK, K)
    wqt = params["w_query"].reshape(H, K).astype(jnp.float32).T      # (K, H)
    wkt = params["w_key"].reshape(H, K).astype(jnp.float32).T        # (K, H)
    gamma = params["gamma"].reshape(1).astype(jnp.float32)
    wp = w_pfs4.reshape(nr1, C).astype(jnp.float32)

    # --- constant structure matrices (resident across the grid):
    #     bias   [(b,n),(b',r)]   = 0 if b == b' else -1e30   (additive softmax mask)
    #     en     [(b,n,r),(b',n')]= 1 iff b == b' and n == n'
    #     er     [(b,n,r),(b',r')]= 1 iff b == b' and r == r'
    #     wp_big [(b,o),(b',c)]   = wp[o,c] iff b == b' else 0
    eye_b = jnp.eye(b_blk, dtype=jnp.float32)
    bias = (jnp.kron(eye_b, jnp.ones((nf, rf), jnp.float32)) - 1.0) * 1e30   # (BN,BR)
    en = jnp.kron(eye_b, jnp.kron(jnp.eye(nf, dtype=jnp.float32),
                                  jnp.ones((rf, 1), jnp.float32)))           # (BC,BN)
    er = jnp.kron(eye_b, jnp.kron(jnp.ones((nf, 1), jnp.float32),
                                  jnp.eye(rf, dtype=jnp.float32)))           # (BC,BR)
    wp_big = jnp.kron(eye_b, wp)                                             # (BO,BC)

    # --- VMEM budget: raise the scoped limit only when large b_blk needs it
    #     (default scoped limit is 16 MiB on v5e, 32 MiB on v6e/v7x).
    const_bytes = 4 * (2 * SK * K + 2 * K * H + BN * BR + BC * BN + BC * BR + BO * BC)
    block_bytes = 4 * ((BN + BR + BO) * SK + BC)
    vmem_est = 2 * (const_bytes + 2 * block_bytes) + (1 << 20)
    vmem_limit = int(vmem_est) if vmem_est > 12 * 1024 * 1024 else None

    hi_all, att_col = pl.pallas_call(
        _feature_crossing_kernel,
        out_shape=(
            jax.ShapeDtypeStruct((n_blk, BO, SK), jnp.float32),
            jax.ShapeDtypeStruct((n_blk, BC, 1), jnp.float32),
        ),
        grid=(n_blk,),
        in_specs=[
            pl.BlockSpec(memory_space=pltpu.MemorySpace.SMEM),   # gamma (1,)
            pl.BlockSpec((1, BN, SK), lambda i: (i, 0, 0)),      # x0_all
            pl.BlockSpec((1, BR, SK), lambda i: (i, 0, 0)),      # xr_all
            pl.BlockSpec((SK, K), lambda i: (0, 0)),             # wx0_big
            pl.BlockSpec((SK, K), lambda i: (0, 0)),             # whi_big
            pl.BlockSpec((K, H), lambda i: (0, 0)),              # w_query^T
            pl.BlockSpec((K, H), lambda i: (0, 0)),              # w_key^T
            pl.BlockSpec((BN, BR), lambda i: (0, 0)),            # additive mask bias
            pl.BlockSpec((BC, BN), lambda i: (0, 0)),            # en
            pl.BlockSpec((BC, BR), lambda i: (0, 0)),            # er
            pl.BlockSpec((BO, BC), lambda i: (0, 0)),            # wp_big
        ],
        out_specs=(
            pl.BlockSpec((1, BO, SK), lambda i: (i, 0, 0)),
            pl.BlockSpec((1, BC, 1), lambda i: (i, 0, 0)),
        ),
        compiler_params=pltpu.CompilerParams(
            dimension_semantics=("parallel",),
            vmem_limit_bytes=vmem_limit),
    )(gamma, x0_all, xr_all, wx0_big, whi_big, wqt, wkt, bias, en, er, wp_big)

    # --- un-plumb outputs back to PyTorch layouts
    hi = hi_all.reshape(n_blk, b_blk, nr1, S, K)
    hi = jnp.transpose(hi, (0, 1, 3, 2, 4)).reshape(b_pad, S, nr1, K)[:B]
    attn = att_col.reshape(b_pad, nf, rf)[:B]
    return hi, attn, w_pfs4


def reference(xr, x0, params):
    """Pure-JAX mirror of the PyTorch forward (eval mode)."""
    B, S, rf, K = xr.shape
    nf = x0.shape[2]
    w_hi = params["w_confuse_hi"].reshape(S)
    w_x0 = params["w_confuse_x0"].reshape(S)
    w_q = params["w_query"].reshape(K // 2, K)
    w_k = params["w_key"].reshape(K // 2, K)
    w_pfs = params["w_pfs"].reshape(params["w_pfs"].shape[0], nf * rf)
    gamma = params["gamma"][0]

    hf = jnp.einsum("s,bsrd->brd", w_hi, xr)
    xf = jnp.einsum("s,bsnd->bnd", w_x0, x0)
    query = jnp.einsum("hk,bnk->bnh", w_q, xf)
    key_ = jnp.einsum("hk,brk->brh", w_k, hf)
    energy = jnp.einsum("bnh,brh->bnr", query, key_)
    attention = jax.nn.softmax(energy, axis=-1)
    value = xr[:, :, None, :, :] * x0[:, :, :, None, :]          # (B,S,nf,rf,K)
    out = gamma * value * attention[:, None, :, :, None] + value
    out = out.reshape(B, S, nf * rf, K)
    hi = jnp.einsum("oc,bscd->bsod", w_pfs, out)                  # (B,S,nr1,K)
    return hi, attention


if __name__ == "__main__":
    def make_inputs(B, S, nf, rf, K, nr1, seed=0):
        key = jax.random.PRNGKey(seed)
        ks = jax.random.split(key, 7)
        xr = jax.random.normal(ks[0], (B, S, rf, K), jnp.float32)
        x0 = jax.random.normal(ks[1], (B, S, nf, K), jnp.float32)
        params = {
            "w_confuse_hi": 0.3 * jax.random.normal(ks[2], (1, S, 1, 1), jnp.float32),
            "w_confuse_x0": 0.3 * jax.random.normal(ks[3], (1, S, 1, 1), jnp.float32),
            "w_query": 0.3 * jax.random.normal(ks[4], (K // 2, K, 1, 1), jnp.float32),
            "w_key": 0.3 * jax.random.normal(ks[5], (K // 2, K, 1, 1), jnp.float32),
            "w_pfs": 0.3 * jax.random.normal(ks[6], (nr1, nf * rf, 1, 1), jnp.float32),
            # PyTorch inits gamma to zeros; use a nonzero value so the
            # attention-modulated path is actually exercised.
            "gamma": jnp.array([0.25], jnp.float32),
        }
        return xr, x0, params

    S, nf, rf, K, nr1 = 4, 3, 6, 16, 8

    # main case: 32 batches, default picker -> b_blk=16, n_blk=2 (no padding,
    # two grid steps so the 'parallel' axis can shard across v7x's 2 TCs)
    xr, x0, params = make_inputs(32, S, nf, rf, K, nr1, seed=0)
    hi, attn, w_pfs_out = feature_crossing(xr, x0, params)
    jax.block_until_ready((hi, attn, w_pfs_out))
    hi_ref, attn_ref = reference(xr, x0, params)
    assert hi.shape == (32, S, nr1, K) and attn.shape == (32, nf, rf)
    assert bool(jnp.allclose(attn, attn_ref, rtol=1e-3, atol=1e-3)), "attention mismatch"
    assert bool(jnp.allclose(hi, hi_ref, rtol=1e-3, atol=1e-3)), "hi mismatch"

    # ragged case: B not a multiple of the batch block -> exercises padding path
    xr2, x02, params2 = make_inputs(6, S, nf, rf, K, nr1, seed=1)
    hi2, attn2, _ = feature_crossing(xr2, x02, params2, b_blk=4)
    jax.block_until_ready((hi2, attn2))
    hi2_ref, attn2_ref = reference(xr2, x02, params2)
    assert bool(jnp.allclose(attn2, attn2_ref, rtol=1e-3, atol=1e-3)), "attention mismatch (ragged)"
    assert bool(jnp.allclose(hi2, hi2_ref, rtol=1e-3, atol=1e-3)), "hi mismatch (ragged)"

    print("KERNEL_OK")
</pallas_src>

<mosaic_0001>
module attributes {stable_mosaic.version = 11 : i64} {
  func.func @_feature_crossing_kernel(%arg0: i32, %arg1: memref<1xf32, #tpu.memory_space<smem>>, %arg2: memref<1x48x64xf32, #tpu.memory_space<vmem>>, %arg3: memref<1x96x64xf32, #tpu.memory_space<vmem>>, %arg4: memref<64x16xf32, #tpu.memory_space<vmem>>, %arg5: memref<64x16xf32, #tpu.memory_space<vmem>>, %arg6: memref<16x8xf32, #tpu.memory_space<vmem>>, %arg7: memref<16x8xf32, #tpu.memory_space<vmem>>, %arg8: memref<48x96xf32, #tpu.memory_space<vmem>>, %arg9: memref<288x48xf32, #tpu.memory_space<vmem>>, %arg10: memref<288x96xf32, #tpu.memory_space<vmem>>, %arg11: memref<128x288xf32, #tpu.memory_space<vmem>>, %arg12: memref<1x128x64xf32, #tpu.memory_space<vmem>>, %arg13: memref<1x288x1xf32, #tpu.memory_space<vmem>>) attributes {dimension_semantics = [#tpu.dimension_semantics<parallel>], iteration_bounds = array<i64: 2>, scalar_prefetch = 0 : i64, scratch_operands = 0 : i64, tpu.core_type = #tpu.core_type<tc>, window_params = [{transform_indices = @transform_0, window_bounds = array<i64: 1>}, {transform_indices = @transform_1, window_bounds = array<i64: 1, 48, 64>}, {transform_indices = @transform_2, window_bounds = array<i64: 1, 96, 64>}, {pipeline_mode = #tpu.pipeline_mode<synchronous>, transform_indices = @transform_3, window_bounds = array<i64: 64, 16>}, {pipeline_mode = #tpu.pipeline_mode<synchronous>, transform_indices = @transform_4, window_bounds = array<i64: 64, 16>}, {pipeline_mode = #tpu.pipeline_mode<synchronous>, transform_indices = @transform_5, window_bounds = array<i64: 16, 8>}, {pipeline_mode = #tpu.pipeline_mode<synchronous>, transform_indices = @transform_6, window_bounds = array<i64: 16, 8>}, {pipeline_mode = #tpu.pipeline_mode<synchronous>, transform_indices = @transform_7, window_bounds = array<i64: 48, 96>}, {pipeline_mode = #tpu.pipeline_mode<synchronous>, transform_indices = @transform_8, window_bounds = array<i64: 288, 48>}, {pipeline_mode = #tpu.pipeline_mode<synchronous>, transform_indices = @transform_9, window_bounds = array<i64: 288, 96>}, {pipeline_mode = #tpu.pipeline_mode<synchronous>, transform_indices = @transform_10, window_bounds = array<i64: 128, 288>}, {transform_indices = @transform_11, window_bounds = array<i64: 1, 128, 64>}, {transform_indices = @transform_12, window_bounds = array<i64: 1, 288, 1>}]} {
    %c0 = arith.constant 0 : index
    %c0_0 = arith.constant 0 : index
    %c0_1 = arith.constant 0 : index
    %0 = vector.load %arg2[%c0, %c0_0, %c0_1] : memref<1x48x64xf32, #tpu.memory_space<vmem>>, vector<1x48x64xf32>
    %1 = vector.shape_cast %0 : vector<1x48x64xf32> to vector<48x64xf32>
    %c0_2 = arith.constant 0 : index
    %c0_3 = arith.constant 0 : index
    %c0_4 = arith.constant 0 : index
    %2 = vector.load %arg3[%c0_2, %c0_3, %c0_4] : memref<1x96x64xf32, #tpu.memory_space<vmem>>, vector<1x96x64xf32>
    %3 = vector.shape_cast %2 : vector<1x96x64xf32> to vector<96x64xf32>
    %c0_5 = arith.constant 0 : index
    %c0_6 = arith.constant 0 : index
    %4 = vector.load %arg4[%c0_5, %c0_6] : memref<64x16xf32, #tpu.memory_space<vmem>>, vector<64x16xf32>
    %cst = arith.constant dense<0.000000e+00> : vector<48x16xf32>
    %5 = tpu.matmul %1, %4, %cst {dimension_numbers = #tpu.dot_dimension_numbers<[1], [0], [0], [1], [0, 0, 1, 1], [], []>} : vector<48x64xf32>, vector<64x16xf32>, vector<48x16xf32> -> vector<48x16xf32>
    %c0_7 = arith.constant 0 : index
    %c0_8 = arith.constant 0 : index
    %6 = vector.load %arg5[%c0_7, %c0_8] : memref<64x16xf32, #tpu.memory_space<vmem>>, vector<64x16xf32>
    %cst_9 = arith.constant dense<0.000000e+00> : vector<96x16xf32>
    %7 = tpu.matmul %3, %6, %cst_9 {dimension_numbers = #tpu.dot_dimension_numbers<[1], [0], [0], [1], [0, 0, 1, 1], [], []>} : vector<96x64xf32>, vector<64x16xf32>, vector<96x16xf32> -> vector<96x16xf32>
    %c0_10 = arith.constant 0 : index
    %c0_11 = arith.constant 0 : index
    %8 = vector.load %arg6[%c0_10, %c0_11] : memref<16x8xf32, #tpu.memory_space<vmem>>, vector<16x8xf32>
    %cst_12 = arith.constant dense<0.000000e+00> : vector<48x8xf32>
    %9 = tpu.matmul %5, %8, %cst_12 {dimension_numbers = #tpu.dot_dimension_numbers<[1], [0], [0], [1], [0, 0, 1, 1], [], []>} : vector<48x16xf32>, vector<16x8xf32>, vector<48x8xf32> -> vector<48x8xf32>
    %c0_13 = arith.constant 0 : index
    %c0_14 = arith.constant 0 : index
    %10 = vector.load %arg7[%c0_13, %c0_14] : memref<16x8xf32, #tpu.memory_space<vmem>>, vector<16x8xf32>
    %cst_15 = arith.constant dense<0.000000e+00> : vector<96x8xf32>
    %11 = tpu.matmul %7, %10, %cst_15 {dimension_numbers = #tpu.dot_dimension_numbers<[1], [0], [0], [1], [0, 0, 1, 1], [], []>} : vector<96x16xf32>, vector<16x8xf32>, vector<96x8xf32> -> vector<96x8xf32>
    %cst_16 = arith.constant dense<0.000000e+00> : vector<48x96xf32>
    %12 = tpu.matmul %9, %11, %cst_16 {dimension_numbers = #tpu.dot_dimension_numbers<[1], [1], [0], [0], [0, 0, 1, 0], [], []>} : vector<48x8xf32>, vector<96x8xf32>, vector<48x96xf32> -> vector<48x96xf32>
    %c0_17 = arith.constant 0 : index
    %c0_18 = arith.constant 0 : index
    %13 = vector.load %arg8[%c0_17, %c0_18] : memref<48x96xf32, #tpu.memory_space<vmem>>, vector<48x96xf32>
    %14 = arith.addf %12, %13 : vector<48x96xf32>
    %cst_19 = arith.constant dense<0xFF800000> : vector<48xf32>
    %15 = vector.multi_reduction <maximumf>, %14, %cst_19 [1] : vector<48x96xf32> to vector<48xf32>
    %16 = vector.shape_cast %15 : vector<48xf32> to vector<48x1xf32>
    %17 = vector.broadcast %16 : vector<48x1xf32> to vector<48x96xf32>
    %18 = arith.subf %14, %17 : vector<48x96xf32>
    %19 = math.exp %18 : vector<48x96xf32>
    %cst_20 = arith.constant dense<0.000000e+00> : vector<48xf32>
    %20 = vector.multi_reduction <add>, %19, %cst_20 [1] : vector<48x96xf32> to vector<48xf32>
    %21 = vector.shape_cast %20 : vector<48xf32> to vector<48x1xf32>
    %22 = vector.broadcast %21 : vector<48x1xf32> to vector<48x96xf32>
    %23 = arith.divf %19, %22 : vector<48x96xf32>
    %c0_21 = arith.constant 0 : index
    %c0_22 = arith.constant 0 : index
    %24 = vector.load %arg9[%c0_21, %c0_22] : memref<288x48xf32, #tpu.memory_space<vmem>>, vector<288x48xf32>
    %cst_23 = arith.constant dense<0.000000e+00> : vector<288x96xf32>
    %25 = tpu.matmul %24, %23, %cst_23 {dimension_numbers = #tpu.dot_dimension_numbers<[1], [0], [0], [1], [0, 0, 1, 1], [], []>} : vector<288x48xf32>, vector<48x96xf32>, vector<288x96xf32> -> vector<288x96xf32>
    %c0_24 = arith.constant 0 : index
    %c0_25 = arith.constant 0 : index
    %26 = vector.load %arg10[%c0_24, %c0_25] : memref<288x96xf32, #tpu.memory_space<vmem>>, vector<288x96xf32>
    %27 = arith.mulf %25, %26 : vector<288x96xf32>
    %cst_26 = arith.constant dense<0.000000e+00> : vector<288xf32>
    %28 = vector.multi_reduction <add>, %27, %cst_26 [1] : vector<288x96xf32> to vector<288xf32>
    %29 = vector.shape_cast %28 : vector<288xf32> to vector<288x1xf32>
    %c0_27 = arith.constant 0 : index
    %c0_28 = arith.constant 0 : index
    %c0_29 = arith.constant 0 : index
    %30 = vector.load %arg13[%c0_27, %c0_28, %c0_29] : memref<1x288x1xf32, #tpu.memory_space<vmem>>, vector<1x288x1xf32>
    %31 = vector.shape_cast %30 : vector<1x288x1xf32> to vector<288x1xf32>
    %32 = vector.shape_cast %29 : vector<288x1xf32> to vector<1x288x1xf32>
    tpu.vector_store %arg13[%c0_27, %c0_28, %c0_29], %32 {strides = array<i32>} : memref<1x288x1xf32, #tpu.memory_space<vmem>>, vector<1x288x1xf32>,
    %c0_30 = arith.constant 0 : index
    %33 = memref.load %arg1[%c0_30] : memref<1xf32, #tpu.memory_space<smem>>
    %34 = vector.broadcast %33 : f32 to vector<288x1xf32>
    %35 = arith.mulf %34, %29 : vector<288x1xf32>
    %cst_31 = arith.constant 1.000000e+00 : f32
    %36 = vector.broadcast %cst_31 : f32 to vector<288x1xf32>
    %37 = arith.addf %36, %35 : vector<288x1xf32>
    %c0_32 = arith.constant 0 : index
    %c0_33 = arith.constant 0 : index
    %38 = vector.load %arg9[%c0_32, %c0_33] : memref<288x48xf32, #tpu.memory_space<vmem>>, vector<288x48xf32>
    %cst_34 = arith.constant dense<0.000000e+00> : vector<288x64xf32>
    %39 = tpu.matmul %38, %1, %cst_34 {dimension_numbers = #tpu.dot_dimension_numbers<[1], [0], [0], [1], [0, 0, 1, 1], [], []>} : vector<288x48xf32>, vector<48x64xf32>, vector<288x64xf32> -> vector<288x64xf32>
    %c0_35 = arith.constant 0 : index
    %c0_36 = arith.constant 0 : index
    %40 = vector.load %arg10[%c0_35, %c0_36] : memref<288x96xf32, #tpu.memory_space<vmem>>, vector<288x96xf32>
    %cst_37 = arith.constant dense<0.000000e+00> : vector<288x64xf32>
    %41 = tpu.matmul %40, %3, %cst_37 {dimension_numbers = #tpu.dot_dimension_numbers<[1], [0], [0], [1], [0, 0, 1, 1], [], []>} : vector<288x96xf32>, vector<96x64xf32>, vector<288x64xf32> -> vector<288x64xf32>
    %42 = arith.mulf %39, %41 : vector<288x64xf32>
    %43 = vector.broadcast %37 : vector<288x1xf32> to vector<288x64xf32>
    %44 = arith.mulf %42, %43 : vector<288x64xf32>
    %c0_38 = arith.constant 0 : index
    %c0_39 = arith.constant 0 : index
    %45 = vector.load %arg11[%c0_38, %c0_39] : memref<128x288xf32, #tpu.memory_space<vmem>>, vector<128x288xf32>
    %cst_40 = arith.constant dense<0.000000e+00> : vector<128x64xf32>
    %46 = tpu.matmul %45, %44, %cst_40 {dimension_numbers = #tpu.dot_dimension_numbers<[1], [0], [0], [1], [0, 0, 1, 1], [], []>} : vector<128x288xf32>, vector<288x64xf32>, vector<128x64xf32> -> vector<128x64xf32>
    %c0_41 = arith.constant 0 : index
    %c0_42 = arith.constant 0 : index
    %c0_43 = arith.constant 0 : index
    %47 = vector.load %arg12[%c0_41, %c0_42, %c0_43] : memref<1x128x64xf32, #tpu.memory_space<vmem>>, vector<1x128x64xf32>
    %48 = vector.shape_cast %47 : vector<1x128x64xf32> to vector<128x64xf32>
    %49 = vector.shape_cast %46 : vector<128x64xf32> to vector<1x128x64xf32>
    tpu.vector_store %arg12[%c0_41, %c0_42, %c0_43], %49 {strides = array<i32>} : memref<1x128x64xf32, #tpu.memory_space<vmem>>, vector<1x128x64xf32>,
    return
  }
  func.func @transform_0(%arg0: i32) -> i32 {
    %c0_i32 = arith.constant 0 : i32
    %c0_i32_0 = arith.constant 0 : i32
    return %c0_i32 : i32
  }
  func.func @transform_1(%arg0: i32) -> (i32, i32, i32) {
    %c0_i32 = arith.constant 0 : i32
    %c0_i32_0 = arith.constant 0 : i32
    %c0_i32_1 = arith.constant 0 : i32
    return %arg0, %c0_i32, %c0_i32_0 : i32, i32, i32
  }
  func.func @transform_2(%arg0: i32) -> (i32, i32, i32) {
    %c0_i32 = arith.constant 0 : i32
    %c0_i32_0 = arith.constant 0 : i32
    %c0_i32_1 = arith.constant 0 : i32
    return %arg0, %c0_i32, %c0_i32_0 : i32, i32, i32
  }
  func.func @transform_3(%arg0: i32) -> (i32, i32) {
    %c0_i32 = arith.constant 0 : i32
    %c0_i32_0 = arith.constant 0 : i32
    %c0_i32_1 = arith.constant 0 : i32
    return %c0_i32, %c0_i32_0 : i32, i32
  }
  func.func @transform_4(%arg0: i32) -> (i32, i32) {
    %c0_i32 = arith.constant 0 : i32
    %c0_i32_0 = arith.constant 0 : i32
    %c0_i32_1 = arith.constant 0 : i32
    return %c0_i32, %c0_i32_0 : i32, i32
  }
  func.func @transform_5(%arg0: i32) -> (i32, i32) {
    %c0_i32 = arith.constant 0 : i32
    %c0_i32_0 = arith.constant 0 : i32
    %c0_i32_1 = arith.constant 0 : i32
    return %c0_i32, %c0_i32_0 : i32, i32
  }
  func.func @transform_6(%arg0: i32) -> (i32, i32) {
    %c0_i32 = arith.constant 0 : i32
    %c0_i32_0 = arith.constant 0 : i32
    %c0_i32_1 = arith.constant 0 : i32
    return %c0_i32, %c0_i32_0 : i32, i32
  }
  func.func @transform_7(%arg0: i32) -> (i32, i32) {
    %c0_i32 = arith.constant 0 : i32
    %c0_i32_0 = arith.constant 0 : i32
    %c0_i32_1 = arith.constant 0 : i32
    return %c0_i32, %c0_i32_0 : i32, i32
  }
  func.func @transform_8(%arg0: i32) -> (i32, i32) {
    %c0_i32 = arith.constant 0 : i32
    %c0_i32_0 = arith.constant 0 : i32
    %c0_i32_1 = arith.constant 0 : i32
    return %c0_i32, %c0_i32_0 : i32, i32
  }
  func.func @transform_9(%arg0: i32) -> (i32, i32) {
    %c0_i32 = arith.constant 0 : i32
    %c0_i32_0 = arith.constant 0 : i32
    %c0_i32_1 = arith.constant 0 : i32
    return %c0_i32, %c0_i32_0 : i32, i32
  }
  func.func @transform_10(%arg0: i32) -> (i32, i32) {
    %c0_i32 = arith.constant 0 : i32
    %c0_i32_0 = arith.constant 0 : i32
    %c0_i32_1 = arith.constant 0 : i32
    return %c0_i32, %c0_i32_0 : i32, i32
  }
  func.func @transform_11(%arg0: i32) -> (i32, i32, i32) {
    %c0_i32 = arith.constant 0 : i32
    %c0_i32_0 = arith.constant 0 : i32
    %c0_i32_1 = arith.constant 0 : i32
    return %arg0, %c0_i32, %c0_i32_0 : i32, i32, i32
  }
  func.func @transform_12(%arg0: i32) -> (i32, i32, i32) {
    %c0_i32 = arith.constant 0 : i32
    %c0_i32_0 = arith.constant 0 : i32
    %c0_i32_1 = arith.constant 0 : i32
    return %arg0, %c0_i32, %c0_i32_0 : i32, i32, i32
  }
}

</mosaic_0001>

<bundles_post_ra>
// kernel: tpu_custom_call.1
= control target key start
LH: loop header
LB: loop body
LE: loop exit
PB: predicated region body
PF: predicated region fallthrough
CT: control target
= control target key end

     0   :  { %s2908_s23 = smov 0   ;;  %s4331_s0 = inlined_call_operand.<no memory space> [shape: f32[1], index: 0, kind: input, shape index: {}]   ;;  %s4332_s1 = inlined_call_operand.vmem [shape: f32[2,48,64], index: 1, kind: input, shape index: {}]   ;;  %s4333_s2 = inlined_call_operand.vmem [shape: f32[2,96,64], index: 2, kind: input, shape index: {}]   ;;  %s4334_s3 = inlined_call_operand.vmem [shape: f32[64,16], index: 3, kind: input, shape index: {}]   ;;  %s4335_s4 = inlined_call_operand.vmem [shape: f32[64,16], index: 4, kind: input, shape index: {}]   ;;  %s4336_s5 = inlined_call_operand.vmem [shape: f32[16,8], index: 5, kind: input, shape index: {}]   ;;  %s4337_s6 = inlined_call_operand.vmem [shape: f32[16,8], index: 6, kind: input, shape index: {}]   ;;  %s4338_s7 = inlined_call_operand.vmem [shape: f32[48,96], index: 7, kind: input, shape index: {}]   ;;  %s4339_s8 = inlined_call_operand.vmem [shape: f32[288,48], index: 8, kind: input, shape index: {}]   ;;  %s4340_s9 = inlined_call_operand.vmem [shape: f32[288,96], index: 9, kind: input, shape index: {}]   ;;  %s4341_s10 = inlined_call_operand.vmem [shape: f32[128,288], index: 10, kind: input, shape index: {}]   ;;  %s4342_s11 = inlined_call_operand.vmem [shape: f32[2,128,64], index: 11, kind: output, shape index: {0}]   ;;  %s4343_s12 = inlined_call_operand.vmem [shape: f32[2,288,1], index: 12, kind: output, shape index: {1}]  }
   0x1   :  { %18 = sst [smem:[#allocation2]] %s4331_s0 }
   0x2 LB: > { %s2592_s24 = sadd.s32 4294967295, %s2838_s23   ;;  %p2596_p0 = scmp.ge.s32.totalorder %s2838_s23, 1  ;;  %s2838_s23 = sphi %s2908_s23, %s24_s23  }
   0x3   : > { %p376_p1 = scmp.lt.s32.totalorder %s2838_s23, 3 }
   0x5   : > { %p377_p2 = pnand %p2596_p0, %p376_p1 }
   0x7   : > { %380 = sbr.rel (%p377_p2) target bundleno = 1702 (0x6a6), region = 64 }
   0xc   : > { %v473_v0 = vld [vmem:[%s4334_s3 + $0x38] sm:$0xff]  ;;  %v472_v1 = vld [vmem:[%s4334_s3 + $0x30] sm:$0xff]  ;;  %p428_p3 = scmp.lt.s32.totalorder %s2592_s24, 1  ;;  %v471_v2 = vld [vmem:[%s4334_s3 + $0x28] sm:$0xff]  ;;  %vm474_vm0 = vcmask 523264   ;;  %vm627_vm1 = vcmask 130048  }
   0xd   : > { %501 = vmatpush.msra.mxu1 %v473_v0  ;;  %2783 = vmatpush.msra.mxu3 %v473_v0  ;;  %v470_v3 = vld [vmem:[%s4334_s3 + $0x20] sm:$0xff]  ;;  %v469_v4 = vld [vmem:[%s4334_s3 + $0x18] sm:$0xff]  ;;  %v468_v5 = vld [vmem:[%s4334_s3 + $0x10] sm:$0xff]  ;;  %vm778_vm2 = vcmask 64512   ;;  %vm868_vm3 = vcmask 785408   ;;  %s1500_s29 = sld [smem:[#allocation2]] }
   0xe   : > { %s4368_s24 = smov (!%p428_p3, %s2592_s24), 1  ;;  %v467_v6 = vld [vmem:[%s4334_s3 + $0x8] sm:$0xff]  ;;  %v466_v7 = vld [vmem:[%s4334_s3] sm:$0xff]  ;;  %v535_v9 = vld [vmem:[%s4335_s4 + $0x38] sm:$0xff] }
   0xf   : > { %502 = vmatpush.msra.mxu1 %v472_v1  ;;  %2784 = vmatpush.msra.mxu3 %v472_v1  ;;  %s2797_s16 = smul.u32 48, %s4368_s24  ;;  %v534_v10 = vld [vmem:[%s4335_s4 + $0x30] sm:$0xff]  ;;  %v533_v11 = vld [vmem:[%s4335_s4 + $0x28] sm:$0xff]  ;;  %v532_v12 = vld [vmem:[%s4335_s4 + $0x20] sm:$0xff]  ;;  %s2782_s0 = sshll.u32 %s4368_s24, 7 }
  0x10   : > { %v531_v14 = vld [vmem:[%s4335_s4 + $0x18] sm:$0xff]  ;;  %v530_v15 = vld [vmem:[%s4335_s4 + $0x10] sm:$0xff]  ;;  %v529_v16 = vld [vmem:[%s4335_s4 + $0x8] sm:$0xff]  ;;  %s2798_s27 = smul.u32 96, %s4368_s24 }
  0x11   : > { %503 = vmatpush.msra.mxu1 %v471_v2  ;;  %2785 = vmatpush.msra.mxu3 %v471_v2  ;;  %s2943_s25 = scalar_lea.vmem %s4332_s1, %s2797_s16  ;;  %v528_v17 = vld [vmem:[%s4335_s4] sm:$0xff]  ;;  %v626_v28 = vld [vmem:[%s4336_s5 + $0x8] sm:$0xff]  ;;  %s2799_s18 = smul.u32 288, %s4368_s24 }
  0x12   : > { %v2949_v8 = vld [vmem:[%s2943_s25] sm:$0xff]  ;;  %v2966_v13 = vld [vmem:[%s2943_s25 + $0x8] sm:$0xff]  ;;  %v2983_v18 = vld [vmem:[%s2943_s25 + $0x10] sm:$0xff]  ;;  %s437_s30 = scalar_lea.vmem %s4333_s2, %s2798_s27  ;;  %660 = vmatpush.msra.mxu2 %v626_v28 }
  0x13   : > { %504 = vmatpush.msra.mxu1 %v470_v3  ;;  %2786 = vmatpush.msra.mxu3 %v470_v3  ;;  %v2988_v19 = vld [vmem:[%s2943_s25 + $0x18] sm:$0xff]  ;;  %v2993_v20 = vld [vmem:[%s2943_s25 + $0x20] sm:$0xff]  ;;  %v455_v22 = vld [vmem:[%s437_s30 + $0x8] sm:$0xff]  ;;  %s3794_s22 = scalar_lea.vmem %s4343_s12, %s2799_s18 }
  0x14   : > { %v454_v21 = vld [vmem:[%s437_s30] sm:$0xff]  ;;  %v456_v23 = vld [vmem:[%s437_s30 + $0x10] sm:$0xff]  ;;  %v457_v24 = vld [vmem:[%s437_s30 + $0x18] sm:$0xff] }
  0x15   : > { %505 = vmatpush.msra.mxu1 %v469_v4  ;;  %2787 = vmatpush.msra.mxu3 %v469_v4  ;;  %v458_v25 = vld [vmem:[%s437_s30 + $0x20] sm:$0xff]  ;;  %v459_v26 = vld [vmem:[%s437_s30 + $0x28] sm:$0xff]  ;;  %v460_v27 = vld [vmem:[%s437_s30 + $0x30] sm:$0xff] }
  0x16   : > { %v625_v29 = vld [vmem:[%s4336_s5] sm:$0xff]  ;;  %v461_v30 = vld [vmem:[%s437_s30 + $0x38] sm:$0xff]  ;;  %v463_v32 = vld [vmem:[%s437_s30 + $0x48] sm:$0xff] }
  0x17   : > { %506 = vmatpush.msra.mxu1 %v468_v5  ;;  %2788 = vmatpush.msra.mxu3 %v468_v5  ;;  %v462_v31 = vld [vmem:[%s437_s30 + $0x40] sm:$0xff]  ;;  %v464_v33 = vld [vmem:[%s437_s30 + $0x50] sm:$0xff]  ;;  %v465_v35 = vld [vmem:[%s437_s30 + $0x58] sm:$0xff] }
  0x18   : > { %661 = vmatpush.msra.mxu2 %v625_v29  ;;  %v3019_v36 = vld [vmem:[%s2943_s25 + $0x28] sm:$0xff]  ;;  %v681_v38 = vld [vmem:[%s4337_s6] sm:$0xff]  ;;  %v774_v28 = vld [vmem:[%s4338_s7 + $0x10] sm:$0xff] }
  0x19   : > { %507 = vmatpush.msra.mxu1 %v467_v6  ;;  %2789 = vmatpush.msra.mxu3 %v467_v6  ;;  %v682_v37 = vld [vmem:[%s4337_s6 + $0x8] sm:$0xff] }
  0x1b   : > { %508 = vmatpush.msra.mxu1 %v466_v7  ;;  %2790 = vmatpush.msra.mxu3 %v466_v7 }
  0x1c   : > { %2602 = vmatmul.msk.f32.vlgmr.msra.gmra.mxu1 %vm474_vm0, %v2949_v8  ;;  %2607 = vmatmul.msk.f32.vlgmr.msra.gmra.mxu3 %vm474_vm0, %v3019_v36 }
  0x1d   : > { %580 = vmatpush.msrb.mxu1 %v535_v9  ;;  %733 = vmatpush.msrb.mxu3 %v682_v37  ;;  %v776_v37 = vld [vmem:[%s4338_s7 + $0x20] sm:$0xff] }
  0x1f   : > { %581 = vmatpush.msrb.mxu1 %v534_v10  ;;  %734 = vmatpush.msrb.mxu3 %v681_v38 }
  0x21   : > { %582 = vmatpush.msrb.mxu1 %v533_v11  ;;  %1991 = vmatpush.msra.mxu3 %v465_v35 }
  0x23   : > { %583 = vmatpush.msrb.mxu1 %v532_v12  ;;  %1992 = vmatpush.msra.mxu3 %v464_v33  ;;  %v773_v12 = vld [vmem:[%s4338_s7 + $0x8] sm:$0xff] }
  0x24   : > { %2603 = vmatmul.msk.f32.gmra.mxu1 %vm474_vm0, %v2966_v13 }
  0x25   : > { %584 = vmatpush.msrb.mxu1 %v531_v14  ;;  %1993 = vmatpush.msra.mxu3 %v463_v32 }
  0x27   : > { %585 = vmatpush.msrb.mxu1 %v530_v15  ;;  %1994 = vmatpush.msra.mxu3 %v462_v31 }
  0x29   : > { %586 = vmatpush.msrb.mxu1 %v529_v16  ;;  %1995 = vmatpush.msra.mxu3 %v461_v30 }
  0x2b   : > { %587 = vmatpush.msrb.mxu1 %v528_v17  ;;  %1996 = vmatpush.msra.mxu3 %v460_v27  ;;  %v772_v17 = vld [vmem:[%s4338_s7] sm:$0xff] }
  0x2c   : > { %2604 = vmatmul.msk.f32.gmra.mxu1 %vm474_vm0, %v2983_v18 }
  0x2d   : > { %1997 = vmatpush.msra.mxu3 %v459_v26 }
  0x2f   : > { %1998 = vmatpush.msra.mxu3 %v458_v25 }
  0x31   : > { %1999 = vmatpush.msra.mxu3 %v457_v24 }
  0x33   : > { %2000 = vmatpush.msra.mxu3 %v456_v23 }
  0x34   : > { %2605 = vmatmul.msk.f32.gmra.mxu1 %vm474_vm0, %v2988_v19 }
  0x35   : > { %2001 = vmatpush.msra.mxu3 %v455_v22 }
  0x37   : > { %2002 = vmatpush.msra.mxu3 %v454_v21 }
  0x3c   : > { %2606 = vmatmul.msk.f32.gmra.mxu1 %vm474_vm0, %v2993_v20 }
  0x44   : > { %2608 = vmatmul.msk.f32.vlgmr.msrb.gmra.mxu1 %vm474_vm0, %v454_v21 }
  0x4c   : > { %2609 = vmatmul.msk.f32.gmra.mxu1 %vm474_vm0, %v455_v22 }
  0x54   : > { %2610 = vmatmul.msk.f32.gmra.mxu1 %vm474_vm0, %v456_v23 }
  0x5c   : > { %2611 = vmatmul.msk.f32.gmra.mxu1 %vm474_vm0, %v457_v24  ;;  %v775_v24 = vld [vmem:[%s4338_s7 + $0x18] sm:$0xff] }
  0x64   : > { %2612 = vmatmul.msk.f32.gmra.mxu1 %vm474_vm0, %v458_v25 }
  0x6c   : > { %2613 = vmatmul.msk.f32.gmra.mxu1 %vm474_vm0, %v459_v26 }
  0x74   : > { %2614 = vmatmul.msk.f32.gmra.mxu1 %vm474_vm0, %v460_v27 }
  0x7c   : > { %2615 = vmatmul.msk.f32.gmra.mxu1 %vm474_vm0, %v461_v30 }
  0x84   : > { %2616 = vmatmul.msk.f32.gmra.mxu1 %vm474_vm0, %v462_v31 }
  0x8c   : > { %2617 = vmatmul.msk.f32.gmra.mxu1 %vm474_vm0, %v463_v32  ;;  %v777_v32 = vld [vmem:[%s4338_s7 + $0x28] sm:$0xff] }
  0x94   : > { %2618 = vmatmul.msk.f32.gmra.mxu1 %vm474_vm0, %v464_v33 }
  0x99   : > { %v510_v34 = vpop.f32.mrf.mxu1 }
  0x9a   : > { %2620 = vmatmul.msk.f32.vlgmr.msra.gmra.mxu2 %vm627_vm1, %v510_v34 }
  0x9c   : > { %2619 = vmatmul.msk.f32.gmra.mxu1 %vm474_vm0, %v465_v35 }
  0x9f   : > { %v525_v55 = vpop.f32.mrf.mxu3 }
  0xa1   : > { %v513_v39 = vpop.f32.mrf.mxu1 }
  0xa2   : > { %2621 = vmatmul.msk.f32.gmra.mxu2 %vm627_vm1, %v513_v39 }
  0xa9   : > { %v516_v40 = vpop.f32.mrf.mxu1 }
  0xaa   : > { %2622 = vmatmul.msk.f32.gmra.mxu2 %vm627_vm1, %v516_v40 }
  0xb1   : > { %v519_v41 = vpop.f32.mrf.mxu1 }
  0xb2   : > { %2623 = vmatmul.msk.f32.gmra.mxu2 %vm627_vm1, %v519_v41 }
  0xb9   : > { %v522_v42 = vpop.f32.mrf.mxu1 }
  0xba   : > { %2624 = vmatmul.msk.f32.gmra.mxu2 %vm627_vm1, %v522_v42 }
  0xc1   : > { %v589_v43 = vpop.f32.mrf.mxu1 }
  0xc2   : > { %2626 = vmatmul.msk.f32.vlgmr.msrb.gmra.mxu3 %vm627_vm1, %v589_v43  ;;  %2625 = vmatmul.msk.f32.gmra.mxu2 %vm627_vm1, %v525_v55 }
  0xc9   : > { %v592_v44 = vpop.f32.mrf.mxu1 }
  0xca   : > { %2627 = vmatmul.msk.f32.gmra.mxu3 %vm627_vm1, %v592_v44 }
  0xd1   : > { %v595_v45 = vpop.f32.mrf.mxu1 }
  0xd2   : > { %2628 = vmatmul.msk.f32.gmra.mxu3 %vm627_vm1, %v595_v45 }
  0xd9   : > { %v598_v46 = vpop.f32.mrf.mxu1 }
  0xda   : > { %2629 = vmatmul.msk.f32.gmra.mxu3 %vm627_vm1, %v598_v46 }
  0xe1   : > { %v601_v47 = vpop.f32.mrf.mxu1 }
  0xe2   : > { %2630 = vmatmul.msk.f32.gmra.mxu3 %vm627_vm1, %v601_v47 }
  0xe9   : > { %v604_v48 = vpop.f32.mrf.mxu1 }
  0xea   : > { %2631 = vmatmul.msk.f32.gmra.mxu3 %vm627_vm1, %v604_v48 }
  0xf1   : > { %v607_v49 = vpop.f32.mrf.mxu1 }
  0xf2   : > { %2632 = vmatmul.msk.f32.gmra.mxu3 %vm627_vm1, %v607_v49 }
  0xf9   : > { %v610_v50 = vpop.f32.mrf.mxu1 }
  0xfa   : > { %2633 = vmatmul.msk.f32.gmra.mxu3 %vm627_vm1, %v610_v50 }
 0x101   : > { %v613_v51 = vpop.f32.mrf.mxu1 }
 0x102   : > { %2634 = vmatmul.msk.f32.gmra.mxu3 %vm627_vm1, %v613_v51 }
 0x109   : > { %v616_v52 = vpop.f32.mrf.mxu1 }
 0x10a   : > { %2635 = vmatmul.msk.f32.gmra.mxu3 %vm627_vm1, %v616_v52 }
 0x111   : > { %v619_v53 = vpop.f32.mrf.mxu1 }
 0x112   : > { %2636 = vmatmul.msk.f32.gmra.mxu3 %vm627_vm1, %v619_v53 }
 0x119   : > { %v622_v54 = vpop.f32.mrf.mxu1 }
 0x11a   : > { %2637 = vmatmul.msk.f32.gmra.mxu3 %vm627_vm1, %v622_v54 }
 0x11d   : > { %v663_v4 = vpop.f32.mrf.mxu2 }
 0x125   : > { %v666_v5 = vpop.f32.mrf.mxu2 }
 0x12d   : > { %v669_v6 = vpop.f32.mrf.mxu2 }
 0x135   : > { %v672_v7 = vpop.f32.mrf.mxu2 }
 0x13d   : > { %v675_v9 = vpop.f32.mrf.mxu2 }
 0x145   : > { %v736_v56 = vpop.f32.mrf.mxu3  ;;  %v678_v10 = vpop.f32.mrf.mxu2 }
 0x14d   : > { %v739_v57 = vpop.f32.mrf.mxu3 }
 0x155   : > { %v742_v58 = vpop.f32.mrf.mxu3 }
 0x15d   : > { %v745_v59 = vpop.f32.mrf.mxu3 }
 0x165   : > { %v748_v60 = vpop.f32.mrf.mxu3 }
 0x16d   : > { %v751_v61 = vpop.f32.mrf.mxu3 }
 0x175   : > { %v754_v62 = vpop.f32.mrf.mxu3 }
 0x17d   : > { %v757_v63 = vpop.f32.mrf.mxu3 }
 0x185   : > { %v760_v0 = vpop.f32.mrf.mxu3 }
 0x18d   : > { %v763_v1 = vpop.f32.mrf.mxu3 }
 0x195   : > { %v766_v2 = vpop.f32.mrf.mxu3 }
 0x19d   : > { %v769_v3 = vpop.f32.mrf.mxu3 }
 0x19e   : > { %2638 = vmatpush.xpose.msk.msrb.mxu2 %vm778_vm2, %v769_v3 }
 0x1a2   : > { %2639 = vmatpush.xpose.msk.msrb.mxu2 %vm778_vm2, %v766_v2 }
 0x1a6   : > { %2640 = vmatpush.xpose.msk.msrb.mxu2 %vm778_vm2, %v763_v1 }
 0x1aa   : > { %2641 = vmatpush.xpose.msk.msrb.mxu2 %vm778_vm2, %v760_v0 }
 0x1ae   : > { %2642 = vmatpush.xpose.msk.msrb.mxu2 %vm778_vm2, %v757_v63 }
 0x1b2   : > { %2643 = vmatpush.xpose.msk.msrb.mxu2 %vm778_vm2, %v754_v62 }
 0x1b6   : > { %2644 = vmatpush.xpose.msk.msrb.mxu2 %vm778_vm2, %v751_v61 }
 0x1ba   : > { %2645 = vmatpush.xpose.msk.msrb.mxu2 %vm778_vm2, %v748_v60 }
 0x1be   : > { %2646 = vmatpush.xpose.msk.msrb.mxu2 %vm778_vm2, %v745_v59 }
 0x1c2   : > { %2647 = vmatpush.xpose.msk.msrb.mxu2 %vm778_vm2, %v742_v58 }
 0x1c6   : > { %2648 = vmatpush.xpose.msk.msrb.mxu2 %vm778_vm2, %v739_v57 }
 0x1ca   : > { %2649 = vmatpush.xpose.msk.msrb.mxu2 %vm778_vm2, %v736_v56 }
 0x1cd   : > { %2650 = vmatmul.msk.f32.vlgmr.msrb.gmra.mxu2 %vm778_vm2, %v663_v4 }
 0x1d5   : > { %2651 = vmatmul.msk.f32.gmra.mxu2 %vm778_vm2, %v666_v5 }
 0x1dd   : > { %2652 = vmatmul.msk.f32.gmra.mxu2 %vm778_vm2, %v669_v6 }
 0x1e5   : > { %2653 = vmatmul.msk.f32.gmra.mxu2 %vm778_vm2, %v672_v7 }
 0x1ed   : > { %2654 = vmatmul.msk.f32.gmra.mxu2 %vm778_vm2, %v675_v9 }
 0x1f5   : > { %2655 = vmatmul.msk.f32.gmra.mxu2 %vm778_vm2, %v678_v10 }
 0x250   : > { %v850_v11 = vpop.f32.mrf.mxu2 }
 0x251   : > { %v851_v21 = vadd.f32 %v850_v11, %v772_v17 }
 0x253   : > { %v869_v23 = vsel %vm868_vm3, %v851_v21, -inf }
 0x258   : > { %v853_v14 = vpop.f32.mrf.mxu2 }
 0x259   : > { %v854_v15 = vadd.f32 %v853_v14, %v773_v12 }
 0x25b   : > { %v872_v16 = vsel %vm868_vm3, %v854_v15, -inf }
 0x25c   : > { %873 = vmax.xlane.f32.xlu2 %v872_v16 }
 0x260   : > { %v856_v22 = vpop.f32.mrf.mxu2 }
 0x261   : > { %v857_v29 = vadd.f32 %v856_v22, %v774_v28 }
 0x263   : > { %v875_v31 = vsel %vm868_vm3, %v857_v29, -inf }
 0x264   : > { %870 = vmax.xlane.f32.xlu2 %v869_v23 }
 0x268   : > { %v859_v25 = vpop.f32.mrf.mxu2 }
 0x269   : > { %v860_v26 = vadd.f32 %v859_v25, %v775_v24 }
 0x26b   : > { %v878_v27 = vsel %vm868_vm3, %v860_v26, -inf }
 0x26c   : > { %879 = vmax.xlane.f32.xlu1 %v878_v27 }
 0x270   : > { %v862_v30 = vpop.f32.mrf.mxu2 }
 0x271   : > { %v863_v38 = vadd.f32 %v862_v30, %v776_v37 }
 0x273   : > { %v881_v39 = vsel %vm868_vm3, %v863_v38, -inf }
 0x274   : > { %876 = vmax.xlane.f32.xlu1 %v875_v31 }
 0x278   : > { %v865_v33 = vpop.f32.mrf.mxu2 }
 0x279   : > { %v866_v34 = vadd.f32 %v865_v33, %v777_v32 }
 0x27b   : > { %v884_v35 = vsel %vm868_vm3, %v866_v34, -inf }
 0x27c   : > { %885 = vmax.xlane.f32.xlu0 %v884_v35 }
 0x284   : > { %882 = vmax.xlane.f32.xlu0 %v881_v39 }
 0x2cf   : > { %v874_v40 = vpop.xlane.xlu2 %873 }
 0x2d0   : > { %v888_v60 = vsub.f32 %v854_v15, %v874_v40 }
 0x2d2   : > { %v895_v63 = vmul.f32 1.442695, %v888_v60  ;;  %v1031_v60 = vld [vmem:[%s4339_s8 + $0x90] sm:$0xff] }
 0x2d7   : > { %v871_v41 = vpop.xlane.xlu2 %870 }
 0x2d8   : > { %v887_v44 = vsub.f32 %v851_v21, %v871_v41 }
 0x2da   : > { %v893_v46 = vmul.f32 1.442695, %v887_v44 }
 0x2df   : > { %v880_v42 = vpop.xlane.xlu1 %879 }
 0x2e0   : > { %v890_v43 = vsub.f32 %v860_v26, %v880_v42 }
 0x2e2   : > { %v899_v45 = vmul.f32 1.442695, %v890_v43 }
 0x2e4   : > { %2808 = vpow2.f32 %v899_v45  ;;  %v1026_v45 = vld [vmem:[%s4339_s8 + $0x68] sm:$0xff] }
 0x2e5   : > { %2810 = vpow2.f32 %v893_v46 }
 0x2e7   : > { %v877_v49 = vpop.xlane.xlu1 %876 }
 0x2e8   : > { %v889_v53 = vsub.f32 %v857_v29, %v877_v49  ;;  %v3327_v49 = vld [vmem:[%s4340_s9 + $0x38] sm:$0xff] }
 0x2ea   : > { %v3090_v47 = vpop.eup %2808  ;;  %v897_v56 = vmul.f32 1.442695, %v889_v53 }
 0x2eb   : > { %v914_v48 = vsel %vm868_vm3, %v3090_v47, 0.0  ;;  %v3094_v51 = vpop.eup %2810 }
 0x2ec   : > { %915 = vadd.xlane.f32.xlu2 %v914_v48  ;;  %v905_v55 = vsel %vm868_vm3, %v3094_v51, 0.0 }
 0x2ef   : > { %v886_v50 = vpop.xlane.xlu0 %885 }
 0x2f0   : > { %v892_v52 = vsub.f32 %v866_v34, %v886_v50 }
 0x2f2   : > { %v903_v54 = vmul.f32 1.442695, %v892_v52 }
 0x2f4   : > { %2812 = vpow2.f32 %v903_v54  ;;  %906 = vadd.xlane.f32.xlu2 %v905_v55 }
 0x2f5   : > { %2814 = vpow2.f32 %v897_v56 }
 0x2f7   : > { %v883_v57 = vpop.xlane.xlu0 %882 }
 0x2f8   : > { %v891_v58 = vsub.f32 %v863_v38, %v883_v57 }
 0x2fa   : > { %v2813_v59 = vpop.eup %2812  ;;  %v901_v61 = vmul.f32 1.442695, %v891_v58 }
 0x2fb   : > { %v920_v62 = vsel %vm868_vm3, %v2813_v59, 0.0  ;;  %v3099_v0 = vpop.eup %2814 }
 0x2fc   : > { %2816 = vpow2.f32 %v901_v61  ;;  %921 = vadd.xlane.f32.xlu0 %v920_v62  ;;  %v911_v3 = vsel %vm868_vm3, %v3099_v0, 0.0 }
 0x2fd   : > { %2818 = vpow2.f32 %v895_v63 }
 0x302   : > { %v3101_v1 = vpop.eup %2816 }
 0x303   : > { %v917_v2 = vsel %vm868_vm3, %v3101_v1, 0.0  ;;  %v3107_v4 = vpop.eup %2818 }
 0x304   : > { %918 = vadd.xlane.f32.xlu1 %v917_v2  ;;  %912 = vadd.xlane.f32.xlu0 %v911_v3  ;;  %v908_v5 = vsel %vm868_vm3, %v3107_v4, 0.0 }
 0x30c   : > { %909 = vadd.xlane.f32.xlu1 %v908_v5 }
 0x35f   : > { %v916_v6 = vpop.xlane.xlu2 %915 }
 0x360   : > { %2820 = vrcp.f32 %v916_v6  ;;  %v977_v31 = vand.u32 2147483647, %v916_v6  ;;  %v979_v32 = vand.u32 2147483648, %v916_v6  ;;  %vm973_vm9 = vweird.f32 %v916_v6 }
 0x362   : > { %vm3135_vm10 = vcmp.eq.f32.partialorder %v977_v31, 8.507059e+37  ;;  %v980_v50 = vor.u32 1.1754944e-38, %v979_v32  ;;  %v1020_v32 = vld [vmem:[%s4339_s8 + $0x38] sm:$0xff] }
 0x366   : > { %v3111_v9 = vpop.eup %2820 }
 0x367   : > { %v3113_v10 = vpop.xlane.xlu2 %906  ;;  %v969_v11 = vmul.f32 %v3111_v9, %v916_v6  ;;  %vm974_vm8 = vweird.f32 %v3111_v9 }
 0x368   : > { %vm3142_vm11 = vmor %vm973_vm9, %vm974_vm8  ;;  %vm928_vm2 = vweird.f32 %v3113_v10  ;;  %v932_v2 = vand.u32 2147483647, %v3113_v10 }
 0x369   : > { %v970_v17 = vsub.f32 1.0, %v969_v11 }
 0x36b   : > { %v971_v26 = vmul.f32 %v3111_v9, %v970_v17 }
 0x36d   : > { %v972_v40 = vadd.f32 %v3111_v9, %v971_v26 }
 0x36f   : > { %v922_v7 = vpop.xlane.xlu0 %921  ;;  %v976_v54 = vsel %vm3142_vm11, %v3111_v9, %v972_v40  ;;  %v3279_v40 = vld [vmem:[%s4340_s9 + $0x18] sm:$0xff] }
 0x370   : > { %2822 = vrcp.f32 %v922_v7  ;;  %v1009_v23 = vand.u32 2147483648, %v922_v7  ;;  %v1007_v25 = vand.u32 2147483647, %v922_v7  ;;  %vm1003_vm5 = vweird.f32 %v922_v7 }
 0x371   : > { %2824 = vrcp.f32 %v3113_v10  ;;  %v981_v5 = vsel %vm3135_vm10, %v980_v50, %v976_v54  ;;  %v1028_v50 = vld [vmem:[%s4339_s8 + $0x78] sm:$0xff]  ;;  %v1029_v54 = vld [vmem:[%s4339_s8 + $0x80] sm:$0xff] }
 0x372   : > { %v1010_v30 = vor.u32 1.1754944e-38, %v1009_v23  ;;  %vm1008_vm7 = vcmp.eq.f32.partialorder %v1007_v25, 8.507059e+37 }
 0x376   : > { %v2823_v12 = vpop.eup %2822 }
 0x377   : > { %v999_v14 = vmul.f32 %v2823_v12, %v922_v7  ;;  %v3117_v15 = vpop.xlane.xlu0 %912  ;;  %v3119_v16 = vpop.xlane.xlu1 %918  ;;  %vm1004_vm4 = vweird.f32 %v2823_v12 }
 0x378   : > { %2826 = vrcp.f32 %v3117_v15  ;;  %v3123_v22 = vpop.eup %2824  ;;  %vm1005_vm6 = vmor %vm1003_vm5, %vm1004_vm4  ;;  %v994_v48 = vand.u32 2147483648, %v3119_v16  ;;  %v992_v53 = vand.u32 2147483647, %v3119_v16  ;;  %vm958_vm14 = vweird.f32 %v3117_v15 }
 0x379   : > { %v1000_v21 = vsub.f32 1.0, %v999_v14  ;;  %2828 = vrcp.f32 %v3119_v16  ;;  %v924_v27 = vmul.f32 %v3123_v22, %v3113_v10  ;;  %v964_v57 = vand.u32 2147483648, %v3117_v15 }
 0x37a   : > { %vm988_vm15 = vweird.f32 %v3119_v16  ;;  %v962_v61 = vand.u32 2147483647, %v3117_v15  ;;  %v995_v63 = vor.u32 1.1754944e-38, %v994_v48  ;;  %vm929_vm5 = vweird.f32 %v3123_v22  ;;  %v1027_v48 = vld [vmem:[%s4339_s8 + $0x70] sm:$0xff] }
 0x37b   : > { %v1001_v24 = vmul.f32 %v2823_v12, %v1000_v21  ;;  %v925_v41 = vsub.f32 1.0, %v924_v27  ;;  %v965_v11 = vor.u32 1.1754944e-38, %v964_v57  ;;  %vm3177_vm9 = vmor %vm928_vm2, %vm929_vm5  ;;  %v1030_v57 = vld [vmem:[%s4339_s8 + $0x88] sm:$0xff] }
 0x37d   : > { %v1002_v28 = vadd.f32 %v2823_v12, %v1001_v24  ;;  %v926_v55 = vmul.f32 %v3123_v22, %v925_v41  ;;  %v982_v24 = vmul.f32 %v3090_v47, %v981_v5  ;;  %v1024_v41 = vld [vmem:[%s4339_s8 + $0x58] sm:$0xff]  ;;  %v3402_v5 = vld [vmem:[%s4339_s8 + $0xa0] sm:$0xff] }
 0x37e   : > { %v2827_v29 = vpop.eup %2826 }
 0x37f   : > { %v2829_v33 = vpop.eup %2828  ;;  %v954_v34 = vmul.f32 %v2827_v29, %v3117_v15  ;;  %v3129_v35 = vpop.xlane.xlu1 %909  ;;  %v1006_v37 = vsel %vm1005_vm6, %v2823_v12, %v1002_v28  ;;  %vm959_vm12 = vweird.f32 %v2827_v29  ;;  %vm993_vm6 = vcmp.eq.f32.partialorder %v992_v53, 8.507059e+37 }
 0x380   : > { %v984_v38 = vmul.f32 %v2829_v33, %v3119_v16  ;;  %2830 = vrcp.f32 %v3129_v35  ;;  %v1011_v39 = vsel %vm1008_vm7, %v1010_v30, %v1006_v37  ;;  %vm989_vm13 = vweird.f32 %v2829_v33  ;;  %vm3154_vm1 = vmor %vm958_vm14, %vm959_vm12  ;;  %v1022_v37 = vld [vmem:[%s4339_s8 + $0x48] sm:$0xff] }
 0x381   : > { %v955_v42 = vsub.f32 1.0, %v954_v34  ;;  %v1012_v43 = vmul.f32 %v2813_v59, %v1011_v39  ;;  %vm990_vm4 = vmor %vm988_vm15, %vm989_vm13  ;;  %v927_v12 = vadd.f32 %v3123_v22, %v926_v55  ;;  %vm963_vm7 = vcmp.eq.f32.partialorder %v962_v61, 8.507059e+37  ;;  %v1021_v34 = vld [vmem:[%s4339_s8 + $0x40] sm:$0xff]  ;;  %v1023_v39 = vld [vmem:[%s4339_s8 + $0x50] sm:$0xff] }
 0x382   : > { %v985_v44 = vsub.f32 1.0, %v984_v38  ;;  %v949_v15 = vand.u32 2147483648, %v3129_v35  ;;  %v934_v16 = vand.u32 2147483648, %v3113_v10  ;;  %v947_v23 = vand.u32 2147483647, %v3129_v35  ;;  %v3267_v38 = vld [vmem:[%s4340_s9 + $0x10] sm:$0xff] }
 0x383   : > { %v956_v46 = vmul.f32 %v2827_v29, %v955_v42  ;;  %1168 = vmatpush.msra.mxu0 %v1012_v43  ;;  %2791 = vmatpush.msra.mxu2 %v1012_v43  ;;  %vm943_vm10 = vweird.f32 %v3129_v35  ;;  %v931_v26 = vsel %vm3177_vm9, %v3123_v22, %v927_v12  ;;  %vm933_vm13 = vcmp.eq.f32.partialorder %v932_v2, 8.507059e+37  ;;  %v3291_v42 = vld [vmem:[%s4340_s9 + $0x20] sm:$0xff]  ;;  %v3353_v55 = vld [vmem:[%s4340_s9 + $0x48] sm:$0xff]  ;;  %v3378_v61 = vld [vmem:[%s4340_s9 + $0x58] sm:$0xff] }
 0x384   : > { %v986_v52 = vmul.f32 %v2829_v33, %v985_v44  ;;  %v950_v47 = vor.u32 1.1754944e-38, %v949_v15  ;;  %v935_v28 = vor.u32 1.1754944e-38, %v934_v16  ;;  %vm948_vm12 = vcmp.eq.f32.partialorder %v947_v23, 8.507059e+37  ;;  %v1025_v43 = vld [vmem:[%s4339_s8 + $0x60] sm:$0xff]  ;;  %v3303_v44 = vld [vmem:[%s4340_s9 + $0x28] sm:$0xff]  ;;  %v3446_v16 = vld [vmem:[%s4340_s9 + $0x78] sm:$0xff] }
 0x385   : > { %v957_v56 = vadd.f32 %v2827_v29, %v956_v46  ;;  %vm1049_vm14 = vcmask 392192   ;;  %v3315_v46 = vld [vmem:[%s4340_s9 + $0x30] sm:$0xff]  ;;  %v3392_v2 = vld [vmem:[%s4340_s9 + $0x60] sm:$0xff]  ;;  %vm1463_vm15 = vcmask 7168  }
 0x386   : > { %v2831_v58 = vpop.eup %2830  ;;  %v987_v59 = vadd.f32 %v2829_v33, %v986_v52  ;;  %v936_v30 = vsel %vm933_vm13, %v935_v28, %v931_v26  ;;  %v3339_v52 = vld [vmem:[%s4340_s9 + $0x40] sm:$0xff]  ;;  %v3484_v28 = vld [vmem:[%s4340_s9 + $0x88] sm:$0xff] }
 0x387   : > { %v939_v62 = vmul.f32 %v2831_v58, %v3129_v35  ;;  %v961_v6 = vsel %vm3154_vm1, %v2827_v29, %v957_v56  ;;  %vm944_vm8 = vweird.f32 %v2831_v58  ;;  %v937_v22 = vmul.f32 %v3094_v51, %v936_v30  ;;  %v3232_v51 = vld [vmem:[%s4339_s8 + $0x118] sm:$0xff]  ;;  %v3255_v35 = vld [vmem:[%s4340_s9 + $0x8] sm:$0xff] }
 0x388   : > { %v991_v3 = vsel %vm990_vm4, %v2829_v33, %v987_v59  ;;  %v966_v21 = vsel %vm963_vm7, %v965_v11, %v961_v6  ;;  %vm945_vm11 = vmor %vm943_vm10, %vm944_vm8  ;;  %v3243_v33 = vld [vmem:[%s4340_s9] sm:$0xff]  ;;  %v3409_v6 = vld [vmem:[%s4340_s9 + $0x68] sm:$0xff] }
 0x389   : > { %v940_v7 = vsub.f32 1.0, %v939_v62  ;;  %v996_v9 = vsel %vm993_vm6, %v995_v63, %v991_v3  ;;  %v967_v27 = vmul.f32 %v3099_v0, %v966_v21  ;;  %v1013_v0 = vld [vmem:[%s4339_s8] sm:$0xff]  ;;  %2728 = vmatmul.msk.f32.vlgmr.msra.gmra.mxu3 %vm868_vm3, %v3243_v33  ;;  %v1032_v63 = vld [vmem:[%s4339_s8 + $0x98] sm:$0xff]  ;;  %v3426_v11 = vld [vmem:[%s4340_s9 + $0x70] sm:$0xff] }
 0x38a   : > { %v997_v14 = vmul.f32 %v3101_v1, %v996_v9  ;;  %v3419_v9 = vld [vmem:[%s4339_s8 + $0xa8] sm:$0xff]  ;;  %v3455_v21 = vld [vmem:[%s4339_s8 + $0xb8] sm:$0xff] }
 0x38b   : > { %v941_v17 = vmul.f32 %v2831_v58, %v940_v7 }
 0x38c   : > { %1169 = vmatpush.msra.mxu0 %v997_v14  ;;  %2792 = vmatpush.msra.mxu2 %v997_v14  ;;  %v3436_v14 = vld [vmem:[%s4339_s8 + $0xb0] sm:$0xff] }
 0x38d   : > { %v942_v25 = vadd.f32 %v2831_v58, %v941_v17 }
 0x38e   : > { %1170 = vmatpush.msra.mxu0 %v982_v24  ;;  %2793 = vmatpush.msra.mxu2 %v982_v24  ;;  %v3465_v24 = vld [vmem:[%s4340_s9 + $0x80] sm:$0xff] }
 0x38f   : > { %v946_v29 = vsel %vm945_vm11, %v2831_v58, %v942_v25  ;;  %v1853_v58 = vld [vmem:[%s4340_s9 + $0x50] sm:$0xff]  ;;  %v3474_v25 = vld [vmem:[%s4339_s8 + $0xc0] sm:$0xff] }
 0x390   : > { %1171 = vmatpush.msra.mxu0 %v967_v27  ;;  %2794 = vmatpush.msra.mxu2 %v967_v27  ;;  %v951_v10 = vsel %vm948_vm12, %v950_v47, %v946_v29 }
 0x391   : > { %v952_v31 = vmul.f32 %v3107_v4, %v951_v10  ;;  %v1014_v4 = vld [vmem:[%s4339_s8 + $0x8] sm:$0xff]  ;;  %2729 = vmatmul.msk.f32.gmra.mxu3 %vm868_vm3, %v3255_v35 }
 0x392   : > { %v3493_v10 = vld [vmem:[%s4339_s8 + $0xc8] sm:$0xff] }
 0x393   : > { %1172 = vmatpush.msra.mxu0 %v952_v31  ;;  %2795 = vmatpush.msra.mxu2 %v952_v31 }
 0x395   : > { %1173 = vmatpush.msra.mxu0 %v937_v22  ;;  %2796 = vmatpush.msra.mxu2 %v937_v22 }
 0x396   : > { %2656 = vmatmul.msk.f32.vlgmr.msra.gmra.mxu0 %vm1049_vm14, %v1013_v0 }
 0x397   : > { %1728 = vmatpush.msrb.mxu2 %v3019_v36  ;;  %v1015_v36 = vld [vmem:[%s4339_s8 + $0x10] sm:$0xff] }
 0x399   : > { %1729 = vmatpush.msrb.mxu2 %v2993_v20  ;;  %v1019_v20 = vld [vmem:[%s4339_s8 + $0x30] sm:$0xff]  ;;  %2730 = vmatmul.msk.f32.gmra.mxu3 %vm868_vm3, %v3267_v38 }
 0x39b   : > { %1730 = vmatpush.msrb.mxu2 %v2988_v19  ;;  %v1016_v19 = vld [vmem:[%s4339_s8 + $0x18] sm:$0xff] }
 0x39d   : > { %1731 = vmatpush.msrb.mxu2 %v2983_v18  ;;  %v1017_v18 = vld [vmem:[%s4339_s8 + $0x20] sm:$0xff] }
 0x39e   : > { %2657 = vmatmul.msk.f32.gmra.mxu0 %vm1049_vm14, %v1014_v4 }
 0x39f   : > { %1732 = vmatpush.msrb.mxu2 %v2966_v13  ;;  %v3221_v13 = vld [vmem:[%s4339_s8 + $0x110] sm:$0xff] }
 0x3a0   : > { %2690 = vmatmul.msk.f32.vlgmr.msra.gmra.mxu2 %vm1049_vm14, %v3221_v13 }
 0x3a1   : > { %1733 = vmatpush.msrb.mxu2 %v2949_v8  ;;  %v1018_v8 = vld [vmem:[%s4339_s8 + $0x28] sm:$0xff]  ;;  %2731 = vmatmul.msk.f32.gmra.mxu3 %vm868_vm3, %v3279_v40 }
 0x3a6   : > { %2658 = vmatmul.msk.f32.gmra.mxu0 %vm1049_vm14, %v1015_v36 }
 0x3a8   : > { %2691 = vmatmul.msk.f32.gmra.mxu2 %vm1049_vm14, %v3232_v51 }
 0x3a9   : > { %2732 = vmatmul.msk.f32.gmra.mxu3 %vm868_vm3, %v3291_v42 }
 0x3ae   : > { %2659 = vmatmul.msk.f32.gmra.mxu0 %vm1049_vm14, %v1016_v19 }
 0x3b0   : > { %2692 = vmatmul.msk.f32.vlgmr.msrb.gmra.mxu2 %vm1049_vm14, %v1013_v0  ;;  %v3503_v0 = vld [vmem:[%s4340_s9 + $0x90] sm:$0xff] }
 0x3b1   : > { %2733 = vmatmul.msk.f32.gmra.mxu3 %vm868_vm3, %v3303_v44 }
 0x3b6   : > { %2660 = vmatmul.msk.f32.gmra.mxu0 %vm1049_vm14, %v1017_v18 }
 0x3b8   : > { %2693 = vmatmul.msk.f32.gmra.mxu2 %vm1049_vm14, %v1014_v4 }
 0x3b9   : > { %2734 = vmatmul.msk.f32.gmra.mxu3 %vm868_vm3, %v3315_v46 }
 0x3be   : > { %2661 = vmatmul.msk.f32.gmra.mxu0 %vm1049_vm14, %v1018_v8 }
 0x3c0   : > { %2694 = vmatmul.msk.f32.gmra.mxu2 %vm1049_vm14, %v1015_v36  ;;  %v3510_v36 = vld [vmem:[%s4339_s8 + $0xd0] sm:$0xff] }
 0x3c1   : > { %2735 = vmatmul.msk.f32.gmra.mxu3 %vm868_vm3, %v3327_v49 }
 0x3c6   : > { %2662 = vmatmul.msk.f32.gmra.mxu0 %vm1049_vm14, %v1019_v20 }
 0x3c8   : > { %2695 = vmatmul.msk.f32.gmra.mxu2 %vm1049_vm14, %v1016_v19 }
 0x3c9   : > { %2736 = vmatmul.msk.f32.gmra.mxu3 %vm868_vm3, %v3339_v52 }
 0x3ce   : > { %2663 = vmatmul.msk.f32.gmra.mxu0 %vm1049_vm14, %v1020_v32 }
 0x3d0   : > { %2696 = vmatmul.msk.f32.gmra.mxu2 %vm1049_vm14, %v1017_v18 }
 0x3d1   : > { %2737 = vmatmul.msk.f32.gmra.mxu3 %vm868_vm3, %v3353_v55 }
 0x3d6   : > { %2664 = vmatmul.msk.f32.gmra.mxu0 %vm1049_vm14, %v1021_v34 }
 0x3d8   : > { %2697 = vmatmul.msk.f32.gmra.mxu2 %vm1049_vm14, %v1018_v8 }
 0x3d9   : > { %2738 = vmatmul.msk.f32.gmra.mxu3 %vm868_vm3, %v1853_v58 }
 0x3de   : > { %2665 = vmatmul.msk.f32.gmra.mxu0 %vm1049_vm14, %v1022_v37 }
 0x3e0   : > { %2698 = vmatmul.msk.f32.gmra.mxu2 %vm1049_vm14, %v1019_v20 }
 0x3e1   : > { %2739 = vmatmul.msk.f32.gmra.mxu3 %vm868_vm3, %v3378_v61 }
 0x3e6   : > { %2666 = vmatmul.msk.f32.gmra.mxu0 %vm1049_vm14, %v1023_v39 }
 0x3e8   : > { %2699 = vmatmul.msk.f32.gmra.mxu2 %vm1049_vm14, %v1020_v32 }
 0x3e9   : > { %2740 = vmatmul.msk.f32.gmra.mxu3 %vm868_vm3, %v3392_v2 }
 0x3ee   : > { %2667 = vmatmul.msk.f32.gmra.mxu0 %vm1049_vm14, %v1024_v41 }
 0x3f0   : > { %2700 = vmatmul.msk.f32.gmra.mxu2 %vm1049_vm14, %v1021_v34  ;;  %v3521_v34 = vld [vmem:[%s4340_s9 + $0x98] sm:$0xff] }
 0x3f1   : > { %2741 = vmatmul.msk.f32.gmra.mxu3 %vm868_vm3, %v3409_v6 }
 0x3f6   : > { %2668 = vmatmul.msk.f32.gmra.mxu0 %vm1049_vm14, %v1025_v43 }
 0x3f8   : > { %2701 = vmatmul.msk.f32.gmra.mxu2 %vm1049_vm14, %v1022_v37 }
 0x3f9   : > { %2742 = vmatmul.msk.f32.gmra.mxu3 %vm868_vm3, %v3426_v11 }
 0x3fe   : > { %2669 = vmatmul.msk.f32.gmra.mxu0 %vm1049_vm14, %v1026_v45 }
 0x400   : > { %2702 = vmatmul.msk.f32.gmra.mxu2 %vm1049_vm14, %v1023_v39  ;;  %v3528_v39 = vld [vmem:[%s4339_s8 + $0xd8] sm:$0xff] }
 0x401   : > { %2743 = vmatmul.msk.f32.gmra.mxu3 %vm868_vm3, %v3446_v16 }
 0x406   : > { %2670 = vmatmul.msk.f32.gmra.mxu0 %vm1049_vm14, %v1027_v48 }
 0x408   : > { %2703 = vmatmul.msk.f32.gmra.mxu2 %vm1049_vm14, %v1024_v41 }
 0x409   : > { %2744 = vmatmul.msk.f32.gmra.mxu3 %vm868_vm3, %v3465_v24 }
 0x40c   : > { %v2004_v27 = vpop.f32.mrf.mxu3 }
 0x40e   : > { %2671 = vmatmul.msk.f32.gmra.mxu0 %vm1049_vm14, %v1028_v50 }
 0x410   : > { %2704 = vmatmul.msk.f32.gmra.mxu2 %vm1049_vm14, %v1025_v43 }
 0x411   : > { %2745 = vmatmul.msk.f32.gmra.mxu3 %vm868_vm3, %v3484_v28 }
 0x413   : > { %v3344_v53 = vpop.f32.mrf.mxu0 }
 0x414   : > { %v2007_v31 = vpop.f32.mrf.mxu3 }
 0x416   : > { %2672 = vmatmul.msk.f32.gmra.mxu0 %vm1049_vm14, %v1029_v54 }
 0x418   : > { %2705 = vmatmul.msk.f32.gmra.mxu2 %vm1049_vm14, %v1026_v45 }
 0x419   : > { %2746 = vmatmul.msk.f32.gmra.mxu3 %vm868_vm3, %v3503_v0 }
 0x41b   : > { %v3358_v56 = vpop.f32.mrf.mxu0 }
 0x41c   : > { %v2010_v8 = vpop.f32.mrf.mxu3 }
 0x41e   : > { %2673 = vmatmul.msk.f32.gmra.mxu0 %vm1049_vm14, %v1030_v57 }
 0x420   : > { %2706 = vmatmul.msk.f32.gmra.mxu2 %vm1049_vm14, %v1027_v48 }
 0x421   : > { %2747 = vmatmul.msk.f32.gmra.mxu3 %vm868_vm3, %v3521_v34 }
 0x423   : > { %v3369_v59 = vpop.f32.mrf.mxu0  ;;  %v3438_v15 = vpop.f32.mrf.mxu2 }
 0x424   : > { %v2013_v45 = vpop.f32.mrf.mxu3 }
 0x426   : > { %2674 = vmatmul.msk.f32.gmra.mxu0 %vm1049_vm14, %v1031_v60 }
 0x428   : > { %2707 = vmatmul.msk.f32.gmra.mxu2 %vm1049_vm14, %v1028_v50 }
 0x42b   : > { %v3383_v62 = vpop.f32.mrf.mxu0  ;;  %v3457_v23 = vpop.f32.mrf.mxu2 }
 0x42e   : > { %2675 = vmatmul.msk.f32.gmra.mxu0 %vm1049_vm14, %v1032_v63 }
 0x430   : > { %2708 = vmatmul.msk.f32.gmra.mxu2 %vm1049_vm14, %v1029_v54  ;;  %v3541_v54 = vld [vmem:[%s4340_s9 + $0xa0] sm:$0xff] }
 0x431   : > { %2748 = vmatmul.msk.f32.gmra.mxu3 %vm868_vm3, %v3541_v54 }
 0x433   : > { %v3397_v3 = vpop.f32.mrf.mxu0  ;;  %v1735_v26 = vpop.f32.mrf.mxu2 }
 0x434   : > { %v3476_v47 = vmul.f32 %v2004_v27, %v1735_v26  ;;  %v3561_v27 = vld [vmem:[%s4340_s9 + $0xa8] sm:$0xff] }
 0x436   : > { %2676 = vmatmul.msk.f32.gmra.mxu0 %vm1049_vm14, %v3402_v5 }
 0x438   : > { %2709 = vmatmul.msk.f32.gmra.mxu2 %vm1049_vm14, %v1030_v57 }
 0x439   : > { %2749 = vmatmul.msk.f32.gmra.mxu3 %vm868_vm3, %v3561_v27 }
 0x43b   : > { %v3414_v7 = vpop.f32.mrf.mxu0  ;;  %v1738_v30 = vpop.f32.mrf.mxu2 }
 0x43c   : > { %v3495_v22 = vmul.f32 %v2007_v31, %v1738_v30  ;;  %v3568_v30 = vld [vmem:[%s4339_s8 + $0xe8] sm:$0xff] }
 0x43e   : > { %2677 = vmatmul.msk.f32.gmra.mxu0 %vm1049_vm14, %v3419_v9 }
 0x440   : > { %2710 = vmatmul.msk.f32.gmra.mxu2 %vm1049_vm14, %v1031_v60 }
 0x443   : > { %v3431_v12 = vpop.f32.mrf.mxu0  ;;  %v1741_v18 = vpop.f32.mrf.mxu2 }
 0x444   : > { %v3512_v20 = vmul.f32 %v2010_v8, %v1741_v18  ;;  %v3581_v8 = vld [vmem:[%s4340_s9 + $0xb0] sm:$0xff] }
 0x445   : > { %2750 = vmatmul.msk.f32.gmra.mxu3 %vm868_vm3, %v3581_v8 }
 0x446   : > { %2678 = vmatmul.msk.f32.gmra.mxu0 %vm1049_vm14, %v3436_v14 }
 0x448   : > { %2711 = vmatmul.msk.f32.gmra.mxu2 %vm1049_vm14, %v1032_v63  ;;  %v2016_v63 = vpop.f32.mrf.mxu3 }
 0x44b   : > { %v3450_v17 = vpop.f32.mrf.mxu0  ;;  %v1744_v43 = vpop.f32.mrf.mxu2 }
 0x44c   : > { %v3531_v48 = vmul.f32 %v2013_v45, %v1744_v43 }
 0x44e   : > { %2679 = vmatmul.msk.f32.gmra.mxu0 %vm1049_vm14, %v3455_v21 }
 0x450   : > { %2712 = vmatmul.msk.f32.gmra.mxu2 %vm1049_vm14, %v3402_v5 }
 0x453   : > { %v3469_v1 = vpop.f32.mrf.mxu0 }
 0x456   : > { %2680 = vmatmul.msk.f32.gmra.mxu0 %vm1049_vm14, %v3474_v25 }
 0x458   : > { %2713 = vmatmul.msk.f32.gmra.mxu2 %vm1049_vm14, %v3419_v9 }
 0x45b   : > { %v3488_v29 = vpop.f32.mrf.mxu0 }
 0x45e   : > { %2681 = vmatmul.msk.f32.gmra.mxu0 %vm1049_vm14, %v3493_v10 }
 0x460   : > { %2714 = vmatmul.msk.f32.gmra.mxu2 %vm1049_vm14, %v3436_v14 }
 0x463   : > { %v1205_v4 = vpop.f32.mrf.mxu0 }
 0x464   : > { %v1329_v19 = vmul.f32 %v1853_v58, %v1205_v4  ;;  %v3548_v58 = vld [vmem:[%s4339_s8 + $0xe0] sm:$0xff] }
 0x466   : > { %2682 = vmatmul.msk.f32.gmra.mxu0 %vm1049_vm14, %v3510_v36  ;;  %v1385_v32 = vsel %vm868_vm3, %v1329_v19, 0.0  ;;  %v2019_v19 = vpop.f32.mrf.mxu3 }
 0x467   : > { %1386 = vadd.xlane.f32.xlu2 %v1385_v32 }
 0x468   : > { %2715 = vmatmul.msk.f32.gmra.mxu2 %vm1049_vm14, %v3455_v21 }
 0x46b   : > { %v1208_v37 = vpop.f32.mrf.mxu0 }
 0x46c   : > { %v1330_v41 = vmul.f32 %v3378_v61, %v1208_v37  ;;  %v1747_v61 = vpop.f32.mrf.mxu2  ;;  %v3590_v37 = vld [vmem:[%s4339_s8 + $0xf0] sm:$0xff] }
 0x46d   : > { %v3551_v26 = vmul.f32 %v2016_v63, %v1747_v61  ;;  %v3615_v61 = vld [vmem:[%s4339_s8 + $0xf8] sm:$0xff] }
 0x46e   : > { %2683 = vmatmul.msk.f32.gmra.mxu0 %vm1049_vm14, %v3528_v39  ;;  %v1388_v50 = vsel %vm868_vm3, %v1330_v41, 0.0  ;;  %v2022_v43 = vpop.f32.mrf.mxu3 }
 0x46f   : > { %1389 = vadd.xlane.f32.xlu1 %v1388_v50 }
 0x470   : > { %2716 = vmatmul.msk.f32.gmra.mxu2 %vm1049_vm14, %v3474_v25  ;;  %v3645_v25 = vld [vmem:[%s4339_s8 + $0x100] sm:$0xff] }
 0x473   : > { %v1211_v57 = vpop.f32.mrf.mxu0 }
 0x474   : > { %v1331_v60 = vmul.f32 %v3392_v2, %v1211_v57  ;;  %v1750_v4 = vpop.f32.mrf.mxu2 }
 0x475   : > { %v3571_v18 = vmul.f32 %v2019_v19, %v1750_v4  ;;  %v1328_v4 = vmul.f32 %v3353_v55, %v3488_v29 }
 0x476   : > { %2684 = vmatmul.msk.f32.gmra.mxu0 %vm1049_vm14, %v3548_v58  ;;  %v1391_v5 = vsel %vm868_vm3, %v1331_v60, 0.0 }
 0x477   : > { %1392 = vadd.xlane.f32.xlu0 %v1391_v5  ;;  %v2025_v5 = vpop.f32.mrf.mxu3  ;;  %v1382_v55 = vsel %vm868_vm3, %v1328_v4, 0.0 }
 0x478   : > { %2717 = vmatmul.msk.f32.gmra.mxu2 %vm1049_vm14, %v3493_v10 }
 0x47b   : > { %v1214_v2 = vpop.f32.mrf.mxu0 }
 0x47c   : > { %v1332_v31 = vmul.f32 %v3409_v6, %v1214_v2  ;;  %v1326_v6 = vmul.f32 %v3327_v49, %v3450_v17  ;;  %v1753_v14 = vpop.f32.mrf.mxu2  ;;  %v3604_v49 = vld [vmem:[%s4340_s9 + $0xb8] sm:$0xff]  ;;  %v1327_v17 = vmul.f32 %v3339_v52, %v3469_v1  ;;  %v1320_v1 = vmul.f32 %v3255_v35, %v3358_v56 }
 0x47d   : > { %v3593_v45 = vmul.f32 %v2022_v43, %v1753_v14  ;;  %2751 = vmatmul.msk.f32.gmra.mxu3 %vm868_vm3, %v3604_v49  ;;  %v1321_v56 = vmul.f32 %v3267_v38, %v3369_v59  ;;  %v3672_v14 = vld [vmem:[%s4339_s8 + $0x108] sm:$0xff]  ;;  %v3682_v38 = vld [vmem:[%s4340_s9 + $0xd0] sm:$0xff]  ;;  %v1322_v59 = vmul.f32 %v3279_v40, %v3383_v62  ;;  %v1319_v40 = vmul.f32 %v3243_v33, %v3344_v53 }
 0x47e   : > { %2685 = vmatmul.msk.f32.gmra.mxu0 %vm1049_vm14, %v3568_v30  ;;  %v1394_v9 = vsel %vm868_vm3, %v1332_v31, 0.0  ;;  %v1376_v50 = vsel %vm868_vm3, %v1326_v6, 0.0  ;;  %v1324_v31 = vmul.f32 %v3303_v44, %v3414_v7  ;;  %v3656_v44 = vld [vmem:[%s4340_s9 + $0xc8] sm:$0xff]  ;;  %v1325_v7 = vmul.f32 %v3315_v46, %v3431_v12 }
 0x47f   : > { %1395 = vadd.xlane.f32.xlu2 %v1394_v9  ;;  %v2028_v6 = vpop.f32.mrf.mxu3  ;;  %v1361_v10 = vsel %vm868_vm3, %v1321_v56, 0.0 }
 0x480   : > { %v1370_v35 = vsel %vm868_vm3, %v1324_v31, 0.0  ;;  %v1373_v46 = vsel %vm868_vm3, %v1325_v7, 0.0  ;;  %2718 = vmatmul.msk.f32.gmra.mxu2 %vm1049_vm14, %v3510_v36  ;;  %v3775_v7 = vld [vmem:[%s4340_s9 + $0x100] sm:$0xff] }
 0x483   : > { %v1217_v32 = vpop.f32.mrf.mxu0 }
 0x484   : > { %v1333_v41 = vmul.f32 %v3426_v11, %v1217_v32  ;;  %v1323_v11 = vmul.f32 %v3291_v42, %v3397_v3  ;;  %v1756_v63 = vpop.f32.mrf.mxu2  ;;  %v1379_v3 = vsel %vm868_vm3, %v1327_v17, 0.0 }
 0x485   : > { %v3618_v2 = vmul.f32 %v2025_v5, %v1756_v63  ;;  %v1364_v63 = vsel %vm868_vm3, %v1322_v59, 0.0 }
 0x486   : > { %2686 = vmatmul.msk.f32.gmra.mxu0 %vm1049_vm14, %v3590_v37  ;;  %v1397_v57 = vsel %vm868_vm3, %v1333_v41, 0.0  ;;  %v1367_v42 = vsel %vm868_vm3, %v1323_v11, 0.0  ;;  %v1358_v41 = vsel %vm868_vm3, %v1320_v1, 0.0  ;;  %v3730_v1 = vld [vmem:[%s4340_s9 + $0xe8] sm:$0xff] }
 0x487   : > { %1377 = vadd.xlane.f32.xlu2 %v1376_v50  ;;  %1398 = vadd.xlane.f32.xlu1 %v1397_v57  ;;  %v2031_v50 = vpop.f32.mrf.mxu3 }
 0x488   : > { %2719 = vmatmul.msk.f32.gmra.mxu2 %vm1049_vm14, %v3528_v39 }
 0x48b   : > { %v1220_v60 = vpop.f32.mrf.mxu0 }
 0x48c   : > { %v1334_v21 = vmul.f32 %v3446_v16, %v1220_v60  ;;  %v3630_v16 = vld [vmem:[%s4340_s9 + $0xc0] sm:$0xff]  ;;  %v1759_v9 = vpop.f32.mrf.mxu2 }
 0x48d   : > { %2752 = vmatmul.msk.f32.gmra.mxu3 %vm868_vm3, %v3630_v16  ;;  %v3647_v32 = vmul.f32 %v2028_v6, %v1759_v9  ;;  %v3745_v9 = vld [vmem:[%s4340_s9 + $0xf0] sm:$0xff] }
 0x48e   : > { %2687 = vmatmul.msk.f32.gmra.mxu0 %vm1049_vm14, %v3615_v61  ;;  %v1400_v52 = vsel %vm868_vm3, %v1334_v21, 0.0  ;;  %v3698_v21 = vld [vmem:[%s4340_s9 + $0xd8] sm:$0xff] }
 0x48f   : > { %1368 = vadd.xlane.f32.xlu2 %v1367_v42  ;;  %1380 = vadd.xlane.f32.xlu1 %v1379_v3  ;;  %v2034_v17 = vpop.f32.mrf.mxu3  ;;  %v3714_v3 = vld [vmem:[%s4340_s9 + $0xe0] sm:$0xff] }
 0x490   : > { %1401 = vadd.xlane.f32.xlu0 %v1400_v52  ;;  %v1355_v52 = vsel %vm868_vm3, %v1319_v40, 0.0  ;;  %2720 = vmatmul.msk.f32.gmra.mxu2 %vm1049_vm14, %v3548_v58 }
 0x493   : > { %v3640_v19 = vpop.f32.mrf.mxu0 }
 0x494   : > { %v1762_v43 = vpop.f32.mrf.mxu2 }
 0x495   : > { %2753 = vmatmul.msk.f32.gmra.mxu3 %vm868_vm3, %v3656_v44  ;;  %v3674_v57 = vmul.f32 %v2031_v50, %v1762_v43 }
 0x496   : > { %2688 = vmatmul.msk.f32.gmra.mxu0 %vm1049_vm14, %v3645_v25 }
 0x497   : > { %1359 = vadd.xlane.f32.xlu2 %v1358_v41  ;;  %1371 = vadd.xlane.f32.xlu1 %v1370_v35  ;;  %v2037_v5 = vpop.f32.mrf.mxu3  ;;  %v3760_v35 = vld [vmem:[%s4340_s9 + $0xf8] sm:$0xff] }
 0x498   : > { %1383 = vadd.xlane.f32.xlu0 %v1382_v55  ;;  %2721 = vmatmul.msk.f32.gmra.mxu2 %vm1049_vm14, %v3568_v30 }
 0x49b   : > { %v3667_v29 = vpop.f32.mrf.mxu0 }
 0x49c   : > { %v1765_v11 = vpop.f32.mrf.mxu2 }
 0x49d   : > { %2754 = vmatmul.msk.f32.gmra.mxu3 %vm868_vm3, %v3682_v38  ;;  %v3693_v60 = vmul.f32 %v2034_v17, %v1765_v11  ;;  %v3789_v11 = vld [vmem:[%s4340_s9 + $0x108] sm:$0xff] }
 0x49e   : > { %2689 = vmatmul.msk.f32.gmra.mxu0 %vm1049_vm14, %v3672_v14  ;;  %4354 = vst [vmem:[#allocation4_spill] sm:$0xff] %v3789_v11 }
 0x49f   : > { %1362 = vadd.xlane.f32.xlu1 %v1361_v10  ;;  %v3725_v39 = vpop.f32.mrf.mxu3 }
 0x4a0   : > { %1374 = vadd.xlane.f32.xlu0 %v1373_v46  ;;  %2722 = vmatmul.msk.f32.gmra.mxu2 %vm1049_vm14, %v3590_v37 }
 0x4a3   : > { %v3691_v12 = vpop.f32.mrf.mxu0 }
 0x4a4   : > { %v1768_v36 = vpop.f32.mrf.mxu2 }
 0x4a5   : > { %2755 = vmatmul.msk.f32.gmra.mxu3 %vm868_vm3, %v3698_v21  ;;  %v3709_v42 = vmul.f32 %v2037_v5, %v1768_v36 }
 0x4a7   : > { %v3740_v4 = vpop.f32.mrf.mxu3 }
 0x4a8   : > { %1365 = vadd.xlane.f32.xlu0 %v1364_v63  ;;  %2723 = vmatmul.msk.f32.gmra.mxu2 %vm1049_vm14, %v3615_v61 }
 0x4ab   : > { %v3707_v62 = vpop.f32.mrf.mxu0 }
 0x4ac   : > { %v3723_v53 = vpop.f32.mrf.mxu2 }
 0x4ad   : > { %2756 = vmatmul.msk.f32.gmra.mxu3 %vm868_vm3, %v3714_v3 }
 0x4af   : > { %v3755_v41 = vpop.f32.mrf.mxu3 }
 0x4b0   : > { %1356 = vadd.xlane.f32.xlu0 %v1355_v52  ;;  %2724 = vmatmul.msk.f32.gmra.mxu2 %vm1049_vm14, %v3645_v25 }
 0x4b3   : > { %v3721_v33 = vpop.f32.mrf.mxu0 }
 0x4b4   : > { %v3738_v31 = vpop.f32.mrf.mxu2 }
 0x4b5   : > { %2757 = vmatmul.msk.f32.gmra.mxu3 %vm868_vm3, %v3730_v1 }
 0x4b7   : > { %v3770_v56 = vpop.f32.mrf.mxu3 }
 0x4b8   : > { %2725 = vmatmul.msk.f32.gmra.mxu2 %vm1049_vm14, %v3672_v14  ;;  %v3812_v14 = vld [vmem:[%s4340_s9 + $0x110] sm:$0xff] }
 0x4bb   : > { %v3736_v58 = vpop.f32.mrf.mxu0 }
 0x4bc   : > { %v3753_v6 = vpop.f32.mrf.mxu2 }
 0x4bd   : > { %2758 = vmatmul.msk.f32.gmra.mxu3 %vm868_vm3, %v3745_v9 }
 0x4bf   : > { %v2052_v10 = vpop.f32.mrf.mxu3 }
 0x4c0   : > { %2726 = vmatmul.msk.f32.gmra.mxu2 %vm1049_vm14, %v3221_v13  ;;  %v3828_v13 = vld [vmem:[%s4340_s9 + $0x118] sm:$0xff] }
 0x4c3   : > { %v3751_v30 = vpop.f32.mrf.mxu0 }
 0x4c4   : > { %v3768_v55 = vpop.f32.mrf.mxu2 }
 0x4c5   : > { %2759 = vmatmul.msk.f32.gmra.mxu3 %vm868_vm3, %v3760_v35 }
 0x4c7   : > { %v2055_v40 = vpop.f32.mrf.mxu3 }
 0x4c8   : > { %2727 = vmatmul.msk.f32.gmra.mxu2 %vm1049_vm14, %v3232_v51 }
 0x4cb   : > { %v3766_v37 = vpop.f32.mrf.mxu0 }
 0x4cc   : > { %v1783_v50 = vpop.f32.mrf.mxu2 }
 0x4cd   : > { %2760 = vmatmul.msk.f32.gmra.mxu3 %vm868_vm3, %v3775_v7  ;;  %v3784_v59 = vmul.f32 %v2052_v10, %v1783_v50 }
 0x4cf   : > { %4353 = vst [vmem:[#allocation3_spill] sm:$0xff] %v3784_v59  ;;  %v2058_v10 = vpop.f32.mrf.mxu3 }
 0x4d3   : > { %v1247_v61 = vpop.f32.mrf.mxu0 }
 0x4d4   : > { %v1343_v43 = vmul.f32 %v3630_v16, %v1247_v61  ;;  %v1786_v63 = vpop.f32.mrf.mxu2 }
 0x4d5   : > { %2761 = vmatmul.msk.f32.gmra.mxu3 %vm868_vm3, %v3789_v11  ;;  %v3807_v5 = vmul.f32 %v2055_v40, %v1786_v63 }
 0x4d6   : > { %v1427_v46 = vsel %vm868_vm3, %v1343_v43, 0.0 }
 0x4d7   : > { %1428 = vadd.xlane.f32.xlu2 %v1427_v46  ;;  %4355 = vst [vmem:[#allocation5_spill] sm:$0xff] %v3807_v5 }
 0x4da   : > { %v3800_v16 = vpop.xlane.xlu2 %1386 }
 0x4db   : > { %1474 = vst.msk [vmem:[%s3794_s22 + $0x50] sm:$0xff] %vm1463_vm15, %v3800_v16  ;;  %v1250_v25 = vpop.f32.mrf.mxu0 }
 0x4dc   : > { %v1344_v17 = vmul.f32 %v3656_v44, %v1250_v25  ;;  %v1789_v50 = vpop.f32.mrf.mxu2 }
 0x4dd   : > { %2762 = vmatmul.msk.f32.gmra.mxu3 %vm868_vm3, %v3812_v14  ;;  %v3830_v46 = vmul.f32 %v2058_v10, %v1789_v50 }
 0x4de   : > { %v1430_v36 = vsel %vm868_vm3, %v1344_v17, 0.0 }
 0x4df   : > { %1431 = vadd.xlane.f32.xlu1 %v1430_v36  ;;  %4356 = vst [vmem:[#allocation6_spill] sm:$0xff] %v3830_v46  ;;  %v2061_v36 = vpop.f32.mrf.mxu3 }
 0x4e2   : > { %v3818_v44 = vpop.xlane.xlu1 %1389 }
 0x4e3   : > { %1475 = vst.msk [vmem:[%s3794_s22 + $0x58] sm:$0xff] %vm1463_vm15, %v3818_v44  ;;  %v1253_v52 = vpop.f32.mrf.mxu0 }
 0x4e4   : > { %v1345_v61 = vmul.f32 %v3682_v38, %v1253_v52  ;;  %v1792_v40 = vpop.f32.mrf.mxu2 }
 0x4e5   : > { %2763 = vmatmul.msk.f32.gmra.mxu3 %vm868_vm3, %v3828_v13  ;;  %v3840_v52 = vmul.f32 %v2061_v36, %v1792_v40 }
 0x4e6   : > { %v1433_v43 = vsel %vm868_vm3, %v1345_v61, 0.0 }
 0x4e7   : > { %1434 = vadd.xlane.f32.xlu0 %v1433_v43  ;;  %4357 = vst [vmem:[#allocation7_spill] sm:$0xff] %v3840_v52  ;;  %v2064_v59 = vpop.f32.mrf.mxu3 }
 0x4ea   : > { %v1393_v38 = vpop.xlane.xlu0 %1392 }
 0x4eb   : > { %1476 = vst.msk [vmem:[%s3794_s22 + $0x60] sm:$0xff] %vm1463_vm15, %v1393_v38  ;;  %v1256_v25 = vpop.f32.mrf.mxu0 }
 0x4ec   : > { %v1346_v17 = vmul.f32 %v3698_v21, %v1256_v25  ;;  %v1795_v10 = vpop.f32.mrf.mxu2 }
 0x4ed   : > { %v3846_v21 = vmul.f32 %v2064_v59, %v1795_v10 }
 0x4ee   : > { %v1436_v63 = vsel %vm868_vm3, %v1346_v17, 0.0 }
 0x4ef   : > { %1437 = vadd.xlane.f32.xlu2 %v1436_v63  ;;  %4358 = vst [vmem:[#allocation8_spill] sm:$0xff] %v3846_v21 }
 0x4f2   : > { %v1396_v61 = vpop.xlane.xlu2 %1395 }
 0x4f3   : > { %1477 = vst.msk [vmem:[%s3794_s22 + $0x68] sm:$0xff] %vm1463_vm15, %v1396_v61  ;;  %v1259_v51 = vpop.f32.mrf.mxu0 }
 0x4f4   : > { %v1347_v43 = vmul.f32 %v3714_v3, %v1259_v51  ;;  %v1798_v36 = vpop.f32.mrf.mxu2  ;;  %v2067_v51 = vpop.f32.mrf.mxu3 }
 0x4f5   : > { %v3857_v59 = vmul.f32 %v2067_v51, %v1798_v36 }
 0x4f6   : > { %v1439_v50 = vsel %vm868_vm3, %v1347_v43, 0.0  ;;  %v1342_v43 = vmul.f32 %v3604_v49, %v3766_v37  ;;  %v2127_v37 = vmul.f32 %v3770_v56, %v3768_v55  ;;  %v2126_v55 = vmul.f32 %v3755_v41, %v3753_v6 }
 0x4f7   : > { %1440 = vadd.xlane.f32.xlu1 %v1439_v50  ;;  %4359 = vst [vmem:[#allocation9_spill] sm:$0xff] %v3857_v59  ;;  %v3861_v50 = vstv %s1500_s29  ;;  %s4279_s29 = scalar_lea.vmem %s4342_s11, %s2782_s0 }
 0x4f8   : > { %v1514_v36 = vmul.f32 %v3861_v50, %v1393_v38 }
 0x4fa   : > { %v3848_v25 = vpop.xlane.xlu2 %1377  ;;  %v1399_v17 = vpop.xlane.xlu1 %1398 }
 0x4fb   : > { %1471 = vst.msk [vmem:[%s3794_s22 + $0x38] sm:$0xff] %vm1463_vm15, %v3848_v25  ;;  %v1262_v63 = vpop.f32.mrf.mxu0  ;;  %v1516_v10 = vmul.f32 %v3861_v50, %v1399_v17 }
 0x4fc   : > { %1478 = vst.msk [vmem:[%s3794_s22 + $0x70] sm:$0xff] %vm1463_vm15, %v1399_v17  ;;  %v1348_v3 = vmul.f32 %v3730_v1, %v1262_v63  ;;  %v1424_v17 = vsel %vm868_vm3, %v1342_v43, 0.0  ;;  %v2070_v59 = vpop.f32.mrf.mxu3  ;;  %v1339_v43 = vmul.f32 %v3541_v54, %v3721_v33 }
 0x4fd   : > { %v1552_v51 = vadd.f32 1.0, %v1516_v10  ;;  %v1340_v10 = vmul.f32 %v3561_v27, %v3736_v58 }
 0x4fe   : > { %v1442_v40 = vsel %vm868_vm3, %v1348_v3, 0.0  ;;  %v1515_v3 = vmul.f32 %v3861_v50, %v1396_v61  ;;  %v1801_v61 = vpop.f32.mrf.mxu2 }
 0x4ff   : > { %1443 = vadd.xlane.f32.xlu0 %v1442_v40  ;;  %v3881_v11 = vmul.f32 %v2070_v59, %v1801_v61  ;;  %v2125_v59 = vmul.f32 %v3740_v4, %v3738_v31  ;;  %v2162_v41 = vmul.f32 %v2126_v55, %v1552_v51  ;;  %v1354_v51 = vmul.f32 %v3828_v13, %v3457_v23 }
 0x500   : > { %v1551_v56 = vadd.f32 1.0, %v1515_v3  ;;  %v1337_v61 = vmul.f32 %v3503_v0, %v3691_v12 }
 0x501   : > { %v1460_v12 = vsel %vm868_vm3, %v1354_v51, 0.0 }
 0x502   : > { %v3864_v5 = vpop.xlane.xlu2 %1368  ;;  %v1381_v46 = vpop.xlane.xlu1 %1380  ;;  %v2161_v4 = vmul.f32 %v2125_v59, %v1551_v56 }
 0x503   : > { %1468 = vst.msk [vmem:[%s3794_s22 + $0x20] sm:$0xff] %vm1463_vm15, %v3864_v5  ;;  %v1402_v1 = vpop.xlane.xlu0 %1401  ;;  %v1265_v63 = vpop.f32.mrf.mxu0 }
 0x504   : > { %1472 = vst.msk [vmem:[%s3794_s22 + $0x40] sm:$0xff] %vm1463_vm15, %v1381_v46  ;;  %v1517_v40 = vmul.f32 %v3861_v50, %v1402_v1  ;;  %v1349_v49 = vmul.f32 %v3745_v9, %v1265_v63  ;;  %v1513_v9 = vmul.f32 %v3861_v50, %v3818_v44  ;;  %v1550_v44 = vadd.f32 1.0, %v1514_v36 }
 0x505   : > { %1479 = vst.msk [vmem:[%s3794_s22 + $0x78] sm:$0xff] %vm1463_vm15, %v1402_v1  ;;  %v1510_v63 = vmul.f32 %v3861_v50, %v1381_v46 }
 0x506   : > { %v1553_v52 = vadd.f32 1.0, %v1517_v40  ;;  %v1445_v21 = vsel %vm868_vm3, %v1349_v49, 0.0  ;;  %v1549_v33 = vadd.f32 1.0, %v1513_v9  ;;  %v1804_v49 = vpop.f32.mrf.mxu2 }
 0x507   : > { %1425 = vadd.xlane.f32.xlu0 %v1424_v17  ;;  %1446 = vadd.xlane.f32.xlu2 %v1445_v21  ;;  %v1512_v21 = vmul.f32 %v3861_v50, %v3800_v16  ;;  %v1415_v16 = vsel %vm868_vm3, %v1339_v43, 0.0  ;;  %v1509_v17 = vmul.f32 %v3861_v50, %v3848_v25  ;;  %v1546_v9 = vadd.f32 1.0, %v1510_v63 }
 0x508   : > { %v2163_v38 = vmul.f32 %v2127_v37, %v1553_v52  ;;  %v2124_v52 = vmul.f32 %v3725_v39, %v3723_v53  ;;  %v1418_v53 = vsel %vm868_vm3, %v1340_v10, 0.0  ;;  %v2073_v37 = vpop.f32.mrf.mxu3  ;;  %v2159_v46 = vmul.f32 %v3709_v42, %v1549_v33 }
 0x509   : > { %v1548_v39 = vadd.f32 1.0, %v1512_v21  ;;  %v1341_v25 = vmul.f32 %v3581_v8, %v3751_v30  ;;  %v1545_v43 = vadd.f32 1.0, %v1509_v17  ;;  %v2156_v8 = vmul.f32 %v3647_v32, %v1546_v9 }
 0x50a   : > { %2281 = vmatpush.msra.mxu1 %v2163_v38  ;;  %v3895_v1 = vpop.xlane.xlu2 %1359  ;;  %v1372_v6 = vpop.xlane.xlu1 %1371  ;;  %v2160_v3 = vmul.f32 %v2124_v52, %v1550_v44  ;;  %v1409_v30 = vsel %vm868_vm3, %v1337_v61, 0.0  ;;  %v1335_v32 = vmul.f32 %v3465_v24, %v3640_v19  ;;  %v1336_v63 = vmul.f32 %v3484_v28, %v3667_v29  ;;  %v2184_v29 = vld [vmem:[%s4341_s10] sm:$0xff] }
 0x50b   : > { %1465 = vst.msk [vmem:[%s3794_s22 + $0x8] sm:$0xff] %vm1463_vm15, %v3895_v1  ;;  %v1384_v54 = vpop.xlane.xlu0 %1383  ;;  %v1268_v27 = vpop.f32.mrf.mxu0  ;;  %v2158_v56 = vmul.f32 %v3693_v60, %v1548_v39  ;;  %v1507_v42 = vmul.f32 %v3861_v50, %v1372_v6  ;;  %v1506_v60 = vmul.f32 %v3861_v50, %v3864_v5  ;;  %v1421_v59 = vsel %vm868_vm3, %v1341_v25, 0.0  ;;  %v2190_v25 = vld [vmem:[%s4341_s10 + $0x30] sm:$0xff] }
 0x50c   : > { %1469 = vst.msk [vmem:[%s3794_s22 + $0x28] sm:$0xff] %vm1463_vm15, %v1372_v6  ;;  %v1511_v58 = vmul.f32 %v3861_v50, %v1384_v54  ;;  %v1350_v31 = vmul.f32 %v3760_v35, %v1268_v27  ;;  %2282 = vmatpush.msra.mxu1 %v2162_v41  ;;  %v3912_v35 = vmul.f32 %v2073_v37, %v1804_v49 }
 0x50d   : > { %1473 = vst.msk [vmem:[%s3794_s22 + $0x48] sm:$0xff] %vm1463_vm15, %v1384_v54  ;;  %v2155_v5 = vmul.f32 %v3618_v2, %v1545_v43  ;;  %v1353_v6 = vmul.f32 %v3812_v14, %v3438_v15  ;;  %v1542_v41 = vadd.f32 1.0, %v1506_v60  ;;  %v1338_v27 = vmul.f32 %v3521_v34, %v3707_v62 }
 0x50e   : > { %2283 = vmatpush.msra.mxu1 %v2161_v4  ;;  %v1448_v40 = vsel %vm868_vm3, %v1350_v31, 0.0  ;;  %v1547_v36 = vadd.f32 1.0, %v1511_v58  ;;  %v1807_v10 = vpop.f32.mrf.mxu2  ;;  %v1503_v2 = vmul.f32 %v3861_v50, %v3895_v1  ;;  %v1403_v34 = vsel %vm868_vm3, %v1335_v32, 0.0 }
 0x50f   : > { %1416 = vadd.xlane.f32.xlu0 %v1415_v16  ;;  %1419 = vadd.xlane.f32.xlu2 %v1418_v53  ;;  %v1457_v19 = vsel %vm868_vm3, %v1353_v6, 0.0  ;;  %v1412_v1 = vsel %vm868_vm3, %v1338_v27, 0.0 }
 0x510   : > { %2284 = vmatpush.msra.mxu1 %v2160_v3  ;;  %1449 = vadd.xlane.f32.xlu1 %v1448_v40  ;;  %v2157_v0 = vmul.f32 %v3674_v57, %v1547_v36  ;;  %v2076_v21 = vpop.f32.mrf.mxu3  ;;  %v1543_v57 = vadd.f32 1.0, %v1507_v42  ;;  %v1539_v53 = vadd.f32 1.0, %v1503_v2  ;;  %v2211_v2 = vld [vmem:[%s4341_s10 + $0xd8] sm:$0xff] }
 0x511   : > { %v3937_v44 = vmul.f32 %v2076_v21, %v1807_v10  ;;  %v2199_v10 = vld [vmem:[%s4341_s10 + $0x78] sm:$0xff] }
 0x512   : > { %2285 = vmatpush.msra.mxu1 %v2159_v46  ;;  %v1363_v55 = vpop.xlane.xlu1 %1362  ;;  %v2153_v24 = vmul.f32 %v3571_v18, %v1543_v57  ;;  %v2149_v49 = vmul.f32 %v3495_v22, %v1539_v53  ;;  %v4360_v22 = vld [vmem:[#allocation4_spill] sm:$0xff] }
 0x513   : > { %1466 = vst.msk [vmem:[%s3794_s22 + $0x10] sm:$0xff] %vm1463_vm15, %v1363_v55  ;;  %v1375_v38 = vpop.xlane.xlu0 %1374  ;;  %v1504_v52 = vmul.f32 %v3861_v50, %v1363_v55  ;;  %v1271_v58 = vpop.f32.mrf.mxu0 }
 0x514   : > { %1470 = vst.msk [vmem:[%s3794_s22 + $0x30] sm:$0xff] %vm1463_vm15, %v1375_v38  ;;  %v1508_v23 = vmul.f32 %v3861_v50, %v1375_v38  ;;  %2286 = vmatpush.msra.mxu1 %v2158_v56  ;;  %v1351_v39 = vmul.f32 %v3775_v7, %v1271_v58  ;;  %v2193_v38 = vld [vmem:[%s4341_s10 + $0x48] sm:$0xff] }
 0x515   : > { %v1540_v14 = vadd.f32 1.0, %v1504_v52 }
 0x516   : > { %v1544_v13 = vadd.f32 1.0, %v1508_v23  ;;  %2287 = vmatpush.msra.mxu1 %v2157_v0  ;;  %v1810_v62 = vpop.f32.mrf.mxu2  ;;  %v1451_v37 = vsel %vm868_vm3, %v1351_v39, 0.0  ;;  %v2196_v23 = vld [vmem:[%s4341_s10 + $0x60] sm:$0xff] }
 0x517   : > { %1461 = vadd.xlane.f32.xlu0 %v1460_v12  ;;  %1410 = vadd.xlane.f32.xlu2 %v1409_v30 }
 0x518   : > { %2288 = vmatpush.msra.mxu1 %v2156_v8  ;;  %1422 = vadd.xlane.f32.xlu1 %v1421_v59  ;;  %v2154_v54 = vmul.f32 %v3593_v45, %v1544_v13  ;;  %v2152_v45 = vmul.f32 %v3551_v26, %v1542_v41  ;;  %v2079_v4 = vpop.f32.mrf.mxu3  ;;  %v2150_v26 = vmul.f32 %v3512_v20, %v1540_v14  ;;  %v1406_v20 = vsel %vm868_vm3, %v1336_v63, 0.0  ;;  %v2205_v41 = vld [vmem:[%s4341_s10 + $0xa8] sm:$0xff]  ;;  %v2214_v14 = vld [vmem:[%s4341_s10 + $0xf0] sm:$0xff] }
 0x519   : > { %v3958_v16 = vmul.f32 %v2079_v4, %v1810_v62  ;;  %v2217_v4 = vld [vmem:[%s4341_s10 + $0x108] sm:$0xff] }
 0x51a   : > { %2289 = vmatpush.msra.mxu1 %v2155_v5  ;;  %v2202_v5 = vld [vmem:[%s4341_s10 + $0x90] sm:$0xff] }
 0x51b   : > { %v1366_v33 = vpop.xlane.xlu0 %1365  ;;  %v1274_v17 = vpop.f32.mrf.mxu0 }
 0x51c   : > { %1467 = vst.msk [vmem:[%s3794_s22 + $0x18] sm:$0xff] %vm1463_vm15, %v1366_v33  ;;  %v1505_v15 = vmul.f32 %v3861_v50, %v1366_v33  ;;  %2290 = vmatpush.msra.mxu1 %v2154_v54  ;;  %v1352_v51 = vmul.f32 %v4360_v22, %v1274_v17  ;;  %v2208_v54 = vld [vmem:[%s4341_s10 + $0xc0] sm:$0xff] }
 0x51e   : > { %v1541_v31 = vadd.f32 1.0, %v1505_v15  ;;  %2291 = vmatpush.msra.mxu1 %v2153_v24  ;;  %v1813_v7 = vpop.f32.mrf.mxu2  ;;  %v1454_v61 = vsel %vm868_vm3, %v1352_v51, 0.0  ;;  %vm2232_vm3 = vcmask 261120  }
 0x51f   : > { %1404 = vadd.xlane.f32.xlu0 %v1403_v34  ;;  %1458 = vadd.xlane.f32.xlu2 %v1457_v19 }
 0x520   : > { %2292 = vmatpush.msra.mxu1 %v2152_v45  ;;  %1413 = vadd.xlane.f32.xlu1 %v1412_v1  ;;  %v2151_v18 = vmul.f32 %v3531_v48, %v1541_v31  ;;  %v2082_v36 = vpop.f32.mrf.mxu3 }
 0x521   : > { %v3971_v46 = vmul.f32 %v2082_v36, %v1813_v7 }
 0x522   : > { %2293 = vmatpush.msra.mxu1 %v2151_v18 }
 0x523   : > { %v1357_v3 = vpop.xlane.xlu0 %1356 }
 0x524   : > { %1464 = vst.msk [vmem:[%s3794_s22] sm:$0xff] %vm1463_vm15, %v1357_v3  ;;  %v1502_v40 = vmul.f32 %v3861_v50, %v1357_v3  ;;  %2294 = vmatpush.msra.mxu1 %v2150_v26 }
 0x526   : > { %v1538_v48 = vadd.f32 1.0, %v1502_v40  ;;  %2295 = vmatpush.msra.mxu1 %v2149_v49  ;;  %v1816_v9 = vpop.f32.mrf.mxu2 }
 0x527   : > { %1452 = vadd.xlane.f32.xlu2 %v1451_v37 }
 0x528   : > { %1407 = vadd.xlane.f32.xlu1 %v1406_v20  ;;  %v2148_v28 = vmul.f32 %v3476_v47, %v1538_v48  ;;  %v2085_v55 = vpop.f32.mrf.mxu3  ;;  %v2187_v47 = vld [vmem:[%s4341_s10 + $0x18] sm:$0xff] }
 0x529   : > { %v3979_v56 = vmul.f32 %v2085_v55, %v1816_v9 }
 0x52a   : > { %2296 = vmatpush.msra.mxu1 %v2148_v28 }
 0x52b   : > { %2297 = vmatmul.f32.vlgmr.msra.gmra.mxu1 %v2184_v29  ;;  %v2220_v29 = vld [vmem:[%s4341_s10 + $0x120] sm:$0xff] }
 0x52e   : > { %v3990_v43 = vpop.f32.mrf.mxu2 }
 0x530   : > { %1455 = vadd.xlane.f32.xlu1 %v1454_v61  ;;  %v3992_v42 = vpop.f32.mrf.mxu3 }
 0x533   : > { %2300 = vmatmul.f32.gmra.mxu1 %v2187_v47 }
 0x536   : > { %v4000_v60 = vpop.f32.mrf.mxu2 }
 0x538   : > { %v2091_v13 = vpop.f32.mrf.mxu3 }
 0x539   : > { %v2141_v51 = vmul.f32 %v2091_v13, %v4000_v60 }
 0x53b   : > { %2303 = vmatmul.f32.gmra.mxu1 %v2190_v25 }
 0x53e   : > { %v1825_v59 = vpop.f32.mrf.mxu2 }
 0x540   : > { %v2094_v57 = vpop.f32.mrf.mxu3 }
 0x541   : > { %v2142_v48 = vmul.f32 %v2094_v57, %v1825_v59 }
 0x543   : > { %2306 = vmatmul.f32.gmra.mxu1 %v2193_v38 }
 0x548   : > { %v2097_v32 = vpop.f32.mrf.mxu3 }
 0x54a   : > { %v1429_v0 = vpop.xlane.xlu2 %1428 }
 0x54b   : > { %1488 = vst.msk [vmem:[%s3794_s22 + $0xc0] sm:$0xff] %vm1463_vm15, %v1429_v0  ;;  %v1526_v12 = vmul.f32 %v3861_v50, %v1429_v0  ;;  %2309 = vmatmul.f32.gmra.mxu1 %v2196_v23 }
 0x54d   : > { %v1562_v8 = vadd.f32 1.0, %v1526_v12  ;;  %v2140_v12 = vmul.f32 %v3992_v42, %v3990_v43  ;;  %v2223_v42 = vld [vmem:[%s4341_s10 + $0x138] sm:$0xff] }
 0x54f   : > { %v4003_v30 = vmul.f32 %v3937_v44, %v1562_v8  ;;  %v1828_v44 = vpop.f32.mrf.mxu2 }
 0x550   : > { %v4028_v58 = vpop.f32.mrf.mxu3  ;;  %v2143_v40 = vmul.f32 %v2097_v32, %v1828_v44 }
 0x552   : > { %v4008_v21 = vpop.xlane.xlu1 %1431 }
 0x553   : > { %1489 = vst.msk [vmem:[%s3794_s22 + $0xc8] sm:$0xff] %vm1463_vm15, %v4008_v21  ;;  %2312 = vmatmul.f32.gmra.mxu1 %v2199_v10  ;;  %v1527_v0 = vmul.f32 %v3861_v50, %v4008_v21 }
 0x557   : > { %v4026_v27 = vpop.f32.mrf.mxu2 }
 0x558   : > { %v4039_v19 = vpop.f32.mrf.mxu3 }
 0x55a   : > { %v1435_v6 = vpop.xlane.xlu0 %1434 }
 0x55b   : > { %1490 = vst.msk [vmem:[%s3794_s22 + $0xd0] sm:$0xff] %vm1463_vm15, %v1435_v6  ;;  %2315 = vmatmul.f32.gmra.mxu1 %v2202_v5  ;;  %v1528_v22 = vmul.f32 %v3861_v50, %v1435_v6  ;;  %v1563_v5 = vadd.f32 1.0, %v1527_v0 }
 0x55d   : > { %v1564_v10 = vadd.f32 1.0, %v1528_v22 }
 0x55f   : > { %v4037_v24 = vpop.f32.mrf.mxu2 }
 0x560   : > { %v2106_v62 = vpop.f32.mrf.mxu3 }
 0x562   : > { %v1438_v52 = vpop.xlane.xlu2 %1437 }
 0x563   : > { %1491 = vst.msk [vmem:[%s3794_s22 + $0xd8] sm:$0xff] %vm1463_vm15, %v1438_v52  ;;  %2318 = vmatmul.f32.gmra.mxu1 %v2205_v41  ;;  %v1529_v17 = vmul.f32 %v3861_v50, %v1438_v52  ;;  %v2174_v41 = vmul.f32 %v3971_v46, %v1564_v10 }
 0x565   : > { %v1565_v60 = vadd.f32 1.0, %v1529_v17 }
 0x567   : > { %v1837_v34 = vpop.f32.mrf.mxu2  ;;  %v2175_v43 = vmul.f32 %v3979_v56, %v1565_v60 }
 0x568   : > { %v2109_v28 = vpop.f32.mrf.mxu3  ;;  %v2146_v52 = vmul.f32 %v2106_v62, %v1837_v34 }
 0x56a   : > { %v1441_v33 = vpop.xlane.xlu1 %1440 }
 0x56b   : > { %1492 = vst.msk [vmem:[%s3794_s22 + $0xe0] sm:$0xff] %vm1463_vm15, %v1441_v33  ;;  %2321 = vmatmul.f32.gmra.mxu1 %v2208_v54  ;;  %v1530_v3 = vmul.f32 %v3861_v50, %v1441_v33 }
 0x56d   : > { %v1566_v61 = vadd.f32 1.0, %v1530_v3 }
 0x56f   : > { %v1840_v20 = vpop.f32.mrf.mxu2  ;;  %v2176_v59 = vmul.f32 %v2140_v12, %v1566_v61  ;;  %v2144_v12 = vmul.f32 %v4028_v58, %v4026_v27  ;;  %v2188_v58 = vld [vmem:[%s4341_s10 + $0x20] sm:$0xff] }
 0x570   : > { %v2147_v23 = vmul.f32 %v2109_v28, %v1840_v20 }
 0x572   : > { %v1444_v15 = vpop.xlane.xlu0 %1443 }
 0x573   : > { %1493 = vst.msk [vmem:[%s3794_s22 + $0xe8] sm:$0xff] %vm1463_vm15, %v1444_v15  ;;  %2324 = vmatmul.f32.gmra.mxu1 %v2211_v2  ;;  %v1531_v26 = vmul.f32 %v3861_v50, %v1444_v15  ;;  %v2173_v15 = vmul.f32 %v3958_v16, %v1563_v5  ;;  %v2226_v16 = vld [vmem:[%s4341_s10 + $0x150] sm:$0xff] }
 0x575   : > { %v1567_v7 = vadd.f32 1.0, %v1531_v26 }
 0x577   : > { %v2177_v13 = vmul.f32 %v2141_v51, %v1567_v7 }
 0x57a   : > { %v1426_v31 = vpop.xlane.xlu0 %1425  ;;  %v1447_v45 = vpop.xlane.xlu2 %1446 }
 0x57b   : > { %1487 = vst.msk [vmem:[%s3794_s22 + $0xb8] sm:$0xff] %vm1463_vm15, %v1426_v31  ;;  %2327 = vmatmul.f32.gmra.mxu1 %v2214_v14  ;;  %v1532_v1 = vmul.f32 %v3861_v50, %v1447_v45  ;;  %v1525_v6 = vmul.f32 %v3861_v50, %v1426_v31 }
 0x57c   : > { %1494 = vst.msk [vmem:[%s3794_s22 + $0xf0] sm:$0xff] %vm1463_vm15, %v1447_v45 }
 0x57d   : > { %v1568_v49 = vadd.f32 1.0, %v1532_v1  ;;  %v1561_v56 = vadd.f32 1.0, %v1525_v6  ;;  %v2194_v6 = vld [vmem:[%s4341_s10 + $0x50] sm:$0xff] }
 0x57f   : > { %v2178_v47 = vmul.f32 %v2142_v48, %v1568_v49  ;;  %v4363_v48 = vld [vmem:[#allocation7_spill] sm:$0xff] }
 0x582   : > { %v4052_v53 = vpop.xlane.xlu0 %1416  ;;  %v1420_v18 = vpop.xlane.xlu2 %1419 }
 0x583   : > { %1484 = vst.msk [vmem:[%s3794_s22 + $0xa0] sm:$0xff] %vm1463_vm15, %v4052_v53  ;;  %v1450_v39 = vpop.xlane.xlu1 %1449  ;;  %2330 = vmatmul.f32.gmra.mxu1 %v2217_v4  ;;  %v1523_v2 = vmul.f32 %v3861_v50, %v1420_v18  ;;  %v1522_v46 = vmul.f32 %v3861_v50, %v4052_v53  ;;  %v2171_v4 = vmul.f32 %v3912_v35, %v1561_v56  ;;  %v2204_v56 = vld [vmem:[%s4341_s10 + $0xa0] sm:$0xff] }
 0x584   : > { %1485 = vst.msk [vmem:[%s3794_s22 + $0xa8] sm:$0xff] %vm1463_vm15, %v1420_v18  ;;  %v1533_v63 = vmul.f32 %v3861_v50, %v1450_v39 }
 0x585   : > { %1495 = vst.msk [vmem:[%s3794_s22 + $0xf8] sm:$0xff] %vm1463_vm15, %v1450_v39  ;;  %v1559_v34 = vadd.f32 1.0, %v1523_v2  ;;  %v1558_v1 = vadd.f32 1.0, %v1522_v46 }
 0x586   : > { %v1569_v37 = vadd.f32 1.0, %v1533_v63 }
 0x588   : > { %v2179_v36 = vmul.f32 %v2143_v40, %v1569_v37  ;;  %v4362_v37 = vld [vmem:[#allocation8_spill] sm:$0xff] }
 0x589   : > { %v2168_v17 = vmul.f32 %v4362_v37, %v1558_v1  ;;  %v2215_v1 = vld [vmem:[%s4341_s10 + $0xf8] sm:$0xff] }
 0x58a   : > { %2346 = vmatpush.msrb.mxu1 %v2179_v36  ;;  %v1462_v9 = vpop.xlane.xlu0 %1461  ;;  %v1411_v55 = vpop.xlane.xlu2 %1410  ;;  %v2229_v36 = vld [vmem:[%s4341_s10 + $0x168] sm:$0xff] }
 0x58b   : > { %1499 = vst.msk [vmem:[%s3794_s22 + $0x118] sm:$0xff] %vm1463_vm15, %v1462_v9  ;;  %v1537_v25 = vmul.f32 %v3861_v50, %v1462_v9  ;;  %v1423_v38 = vpop.xlane.xlu1 %1422  ;;  %2333 = vmatmul.f32.gmra.mxu1 %v2220_v29  ;;  %v1520_v53 = vmul.f32 %v3861_v50, %v1411_v55  ;;  %v4364_v29 = vld [vmem:[#allocation6_spill] sm:$0xff]  ;;  %v4365_v9 = vld [vmem:[#allocation5_spill] sm:$0xff] }
 0x58c   : > { %1482 = vst.msk [vmem:[%s3794_s22 + $0x90] sm:$0xff] %vm1463_vm15, %v1411_v55  ;;  %2347 = vmatpush.msrb.mxu1 %v2178_v47  ;;  %v1524_v21 = vmul.f32 %v3861_v50, %v1423_v38  ;;  %v2145_v47 = vmul.f32 %v4039_v19, %v4037_v24  ;;  %v2186_v24 = vld [vmem:[%s4341_s10 + $0x10] sm:$0xff]  ;;  %v2189_v19 = vld [vmem:[%s4341_s10 + $0x28] sm:$0xff] }
 0x58d   : > { %v1573_v8 = vadd.f32 1.0, %v1537_v25  ;;  %1486 = vst.msk [vmem:[%s3794_s22 + $0xb0] sm:$0xff] %vm1463_vm15, %v1423_v38  ;;  %v1556_v40 = vadd.f32 1.0, %v1520_v53  ;;  %v4366_v25 = vld [vmem:[#allocation3_spill] sm:$0xff] }
 0x58e   : > { %2348 = vmatpush.msrb.mxu1 %v2177_v13  ;;  %v1560_v31 = vadd.f32 1.0, %v1524_v21  ;;  %v2197_v21 = vld [vmem:[%s4341_s10 + $0x68] sm:$0xff]  ;;  %v2216_v53 = vld [vmem:[%s4341_s10 + $0x100] sm:$0xff] }
 0x58f   : > { %v2183_v57 = vmul.f32 %v2147_v23, %v1573_v8  ;;  %v2166_v22 = vmul.f32 %v4364_v29, %v1556_v40  ;;  %v2224_v40 = vld [vmem:[%s4341_s10 + $0x140] sm:$0xff] }
 0x590   : > { %2349 = vmatpush.msrb.mxu1 %v2176_v59  ;;  %v2170_v39 = vmul.f32 %v3881_v11, %v1560_v31  ;;  %v2191_v59 = vld [vmem:[%s4341_s10 + $0x38] sm:$0xff]  ;;  %v2209_v31 = vld [vmem:[%s4341_s10 + $0xc8] sm:$0xff] }
 0x591   : > { %2423 = vmatpush.msrb.mxu0 %v2183_v57  ;;  %v2192_v57 = vld [vmem:[%s4341_s10 + $0x40] sm:$0xff] }
 0x592   : > { %2350 = vmatpush.msrb.mxu1 %v2175_v43  ;;  %v1405_v44 = vpop.xlane.xlu0 %1404  ;;  %v1459_v32 = vpop.xlane.xlu2 %1458  ;;  %v2195_v43 = vld [vmem:[%s4341_s10 + $0x58] sm:$0xff] }
 0x593   : > { %1480 = vst.msk [vmem:[%s3794_s22 + $0x80] sm:$0xff] %vm1463_vm15, %v1405_v44  ;;  %v1536_v54 = vmul.f32 %v3861_v50, %v1459_v32  ;;  %v1414_v33 = vpop.xlane.xlu1 %1413  ;;  %2336 = vmatmul.f32.gmra.mxu1 %v2223_v42  ;;  %v1518_v49 = vmul.f32 %v3861_v50, %v1405_v44  ;;  %v2198_v44 = vld [vmem:[%s4341_s10 + $0x70] sm:$0xff] }
 0x594   : > { %1498 = vst.msk [vmem:[%s3794_s22 + $0x110] sm:$0xff] %vm1463_vm15, %v1459_v32  ;;  %2351 = vmatpush.msrb.mxu1 %v2174_v41  ;;  %v1521_v62 = vmul.f32 %v3861_v50, %v1414_v33  ;;  %v2200_v41 = vld [vmem:[%s4341_s10 + $0x80] sm:$0xff] }
 0x595   : > { %v1572_v14 = vadd.f32 1.0, %v1536_v54  ;;  %1483 = vst.msk [vmem:[%s3794_s22 + $0x98] sm:$0xff] %vm1463_vm15, %v1414_v33  ;;  %v1554_v20 = vadd.f32 1.0, %v1518_v49  ;;  %v2203_v33 = vld [vmem:[%s4341_s10 + $0x98] sm:$0xff]  ;;  %v2225_v49 = vld [vmem:[%s4341_s10 + $0x148] sm:$0xff] }
 0x596   : > { %2352 = vmatpush.msrb.mxu1 %v2173_v15  ;;  %v1557_v63 = vadd.f32 1.0, %v1521_v62  ;;  %v2206_v15 = vld [vmem:[%s4341_s10 + $0xb0] sm:$0xff]  ;;  %v2212_v62 = vld [vmem:[%s4341_s10 + $0xe0] sm:$0xff] }
 0x597   : > { %v2182_v45 = vmul.f32 %v2146_v52, %v1572_v14  ;;  %v2164_v38 = vmul.f32 %v4366_v25, %v1554_v20  ;;  %v2201_v52 = vld [vmem:[%s4341_s10 + $0x88] sm:$0xff]  ;;  %v2207_v14 = vld [vmem:[%s4341_s10 + $0xb8] sm:$0xff] }
 0x598   : > { %2353 = vmatpush.msrb.mxu1 %v4003_v30  ;;  %v4361_v30 = vld [vmem:[#allocation9_spill] sm:$0xff]  ;;  %v2167_v7 = vmul.f32 %v4363_v48, %v1557_v63 }
 0x599   : > { %2424 = vmatpush.msrb.mxu0 %v2182_v45  ;;  %v2169_v3 = vmul.f32 %v4361_v30, %v1559_v34  ;;  %v2210_v45 = vld [vmem:[%s4341_s10 + $0xd0] sm:$0xff] }
 0x59a   : > { %2354 = vmatpush.msrb.mxu1 %v2171_v4  ;;  %v1453_v18 = vpop.xlane.xlu2 %1452  ;;  %v2213_v4 = vld [vmem:[%s4341_s10 + $0xe8] sm:$0xff]  ;;  %v2222_v30 = vld [vmem:[%s4341_s10 + $0x130] sm:$0xff] }
 0x59b   : > { %v1408_v26 = vpop.xlane.xlu1 %1407  ;;  %1496 = vst.msk [vmem:[%s3794_s22 + $0x100] sm:$0xff] %vm1463_vm15, %v1453_v18  ;;  %2339 = vmatmul.f32.gmra.mxu1 %v2226_v16  ;;  %v1534_v28 = vmul.f32 %v3861_v50, %v1453_v18 }
 0x59c   : > { %1481 = vst.msk [vmem:[%s3794_s22 + $0x88] sm:$0xff] %vm1463_vm15, %v1408_v26  ;;  %v1519_v35 = vmul.f32 %v3861_v50, %v1408_v26  ;;  %2355 = vmatpush.msrb.mxu1 %v2170_v39  ;;  %v2218_v39 = vld [vmem:[%s4341_s10 + $0x110] sm:$0xff]  ;;  %v2219_v26 = vld [vmem:[%s4341_s10 + $0x118] sm:$0xff] }
 0x59d   : > { %v1570_v23 = vadd.f32 1.0, %v1534_v28 }
 0x59e   : > { %2356 = vmatpush.msrb.mxu1 %v2169_v3  ;;  %v1555_v11 = vadd.f32 1.0, %v1519_v35  ;;  %v2221_v35 = vld [vmem:[%s4341_s10 + $0x128] sm:$0xff] }
 0x59f   : > { %v2180_v8 = vmul.f32 %v2144_v12, %v1570_v23 }
 0x5a0   : > { %2357 = vmatpush.msrb.mxu1 %v2168_v17  ;;  %v2165_v55 = vmul.f32 %v4365_v9, %v1555_v11  ;;  %v2227_v17 = vld [vmem:[%s4341_s10 + $0x158] sm:$0xff]  ;;  %v2228_v11 = vld [vmem:[%s4341_s10 + $0x160] sm:$0xff] }
 0x5a2   : > { %2358 = vmatpush.msrb.mxu1 %v2167_v7  ;;  %v2230_v7 = vld [vmem:[%s4341_s10 + $0x170] sm:$0xff] }
 0x5a3   : > { %v1456_v51 = vpop.xlane.xlu1 %1455  ;;  %2342 = vmatmul.f32.gmra.mxu1 %v2229_v36  ;;  %v2231_v36 = vld [vmem:[%s4341_s10 + $0x178] sm:$0xff] }
 0x5a4   : > { %1497 = vst.msk [vmem:[%s3794_s22 + $0x108] sm:$0xff] %vm1463_vm15, %v1456_v51  ;;  %v1535_v61 = vmul.f32 %v3861_v50, %v1456_v51  ;;  %2359 = vmatpush.msrb.mxu1 %v2166_v22  ;;  %v2185_v50 = vld [vmem:[%s4341_s10 + $0x8] sm:$0xff] }
 0x5a6   : > { %v1571_v0 = vadd.f32 1.0, %v1535_v61  ;;  %2360 = vmatpush.msrb.mxu1 %v2165_v55 }
 0x5a8   : > { %2361 = vmatpush.msrb.mxu1 %v2164_v38  ;;  %v2181_v60 = vmul.f32 %v2145_v47, %v1571_v0  ;;  %v4130_v13 = vpop.f32.mrf.mxu1 }
 0x5aa   : > { %2425 = vmatpush.msrb.mxu0 %v2181_v60 }
 0x5ab   : > { %2362 = vmatmul.f32.vlgmr.msrb.gmra.mxu1 %v2185_v50 }
 0x5ac   : > { %2426 = vmatpush.msrb.mxu0 %v2180_v8 }
 0x5ad   : > { %2764 = vmatmul.msk.f32.vlgmr.msrb.gmra.mxu0 %vm2232_vm3, %v2186_v24 }
 0x5b0   : > { %v4139_v27 = vpop.f32.mrf.mxu1 }
 0x5b3   : > { %2365 = vmatmul.f32.gmra.mxu1 %v2188_v58 }
 0x5b5   : > { %2765 = vmatmul.msk.f32.gmra.mxu0 %vm2232_vm3, %v2189_v19 }
 0x5b8   : > { %v4148_v10 = vpop.f32.mrf.mxu1 }
 0x5bb   : > { %2368 = vmatmul.f32.gmra.mxu1 %v2191_v59 }
 0x5bd   : > { %2766 = vmatmul.msk.f32.gmra.mxu0 %vm2232_vm3, %v2192_v57 }
 0x5c0   : > { %v4157_v5 = vpop.f32.mrf.mxu1 }
 0x5c3   : > { %2371 = vmatmul.f32.gmra.mxu1 %v2194_v6 }
 0x5c5   : > { %2767 = vmatmul.msk.f32.gmra.mxu0 %vm2232_vm3, %v2195_v43 }
 0x5c8   : > { %v4166_v42 = vpop.f32.mrf.mxu1 }
 0x5cb   : > { %2374 = vmatmul.f32.gmra.mxu1 %v2197_v21 }
 0x5cd   : > { %2768 = vmatmul.msk.f32.gmra.mxu0 %vm2232_vm3, %v2198_v44 }
 0x5d0   : > { %v4175_v32 = vpop.f32.mrf.mxu1 }
 0x5d3   : > { %2377 = vmatmul.f32.gmra.mxu1 %v2200_v41 }
 0x5d5   : > { %2769 = vmatmul.msk.f32.gmra.mxu0 %vm2232_vm3, %v2201_v52 }
 0x5d8   : > { %v4184_v54 = vpop.f32.mrf.mxu1 }
 0x5db   : > { %2380 = vmatmul.f32.gmra.mxu1 %v2203_v33 }
 0x5dd   : > { %2770 = vmatmul.msk.f32.gmra.mxu0 %vm2232_vm3, %v2204_v56 }
 0x5e0   : > { %v4193_v2 = vpop.f32.mrf.mxu1 }
 0x5e3   : > { %2383 = vmatmul.f32.gmra.mxu1 %v2206_v15 }
 0x5e5   : > { %2771 = vmatmul.msk.f32.gmra.mxu0 %vm2232_vm3, %v2207_v14 }
 0x5e8   : > { %v4202_v46 = vpop.f32.mrf.mxu1 }
 0x5eb   : > { %2386 = vmatmul.f32.gmra.mxu1 %v2209_v31 }
 0x5ed   : > { %2772 = vmatmul.msk.f32.gmra.mxu0 %vm2232_vm3, %v2210_v45 }
 0x5f0   : > { %v4211_v34 = vpop.f32.mrf.mxu1 }
 0x5f3   : > { %2389 = vmatmul.f32.gmra.mxu1 %v2212_v62 }
 0x5f5   : > { %2773 = vmatmul.msk.f32.gmra.mxu0 %vm2232_vm3, %v2213_v4 }
 0x5f8   : > { %v4220_v16 = vpop.f32.mrf.mxu1 }
 0x5fb   : > { %2392 = vmatmul.f32.gmra.mxu1 %v2215_v1 }
 0x5fd   : > { %2774 = vmatmul.msk.f32.gmra.mxu0 %vm2232_vm3, %v2216_v53 }
 0x600   : > { %v4229_v18 = vpop.f32.mrf.mxu1 }
 0x603   : > { %2395 = vmatmul.f32.gmra.mxu1 %v2218_v39 }
 0x605   : > { %2775 = vmatmul.msk.f32.gmra.mxu0 %vm2232_vm3, %v2219_v26 }
 0x608   : > { %v4238_v63 = vpop.f32.mrf.mxu1 }
 0x60b   : > { %2398 = vmatmul.f32.gmra.mxu1 %v2221_v35 }
 0x60d   : > { %2776 = vmatmul.msk.f32.gmra.mxu0 %vm2232_vm3, %v2222_v30 }
 0x610   : > { %v4247_v3 = vpop.f32.mrf.mxu1 }
 0x613   : > { %2401 = vmatmul.f32.gmra.mxu1 %v2224_v40 }
 0x615   : > { %2777 = vmatmul.msk.f32.gmra.mxu0 %vm2232_vm3, %v2225_v49 }
 0x618   : > { %v4256_v37 = vpop.f32.mrf.mxu1 }
 0x61b   : > { %2404 = vmatmul.f32.gmra.mxu1 %v2227_v17 }
 0x61d   : > { %2778 = vmatmul.msk.f32.gmra.mxu0 %vm2232_vm3, %v2228_v11 }
 0x620   : > { %v4265_v48 = vpop.f32.mrf.mxu1 }
 0x623   : > { %2407 = vmatmul.f32.gmra.mxu1 %v2230_v7 }
 0x625   : > { %2779 = vmatmul.msk.f32.gmra.mxu0 %vm2232_vm3, %v2231_v36 }
 0x628   : > { %v2363_v20 = vpop.f32.mrf.mxu1 }
 0x629   : > { %v2364_v28 = vadd.f32 %v2363_v20, %v4130_v13 }
 0x62a   : > { %v2428_v29 = vpop.f32.mrf.mxu0 }
 0x62b   : > { %v2429_v22 = vadd.f32 %v2428_v29, %v2364_v28 }
 0x62d   : > { %2476 = vst.msk [vmem:[%s4279_s29] sm:$0xff] %vm474_vm0, %v2429_v22 }
 0x630   : > { %v2366_v51 = vpop.f32.mrf.mxu1 }
 0x631   : > { %v2367_v61 = vadd.f32 %v2366_v51, %v4139_v27 }
 0x632   : > { %v2431_v9 = vpop.f32.mrf.mxu0 }
 0x633   : > { %v2432_v55 = vadd.f32 %v2431_v9, %v2367_v61 }
 0x635   : > { %2477 = vst.msk [vmem:[%s4279_s29 + $0x8] sm:$0xff] %vm474_vm0, %v2432_v55 }
 0x638   : > { %v2369_v47 = vpop.f32.mrf.mxu1 }
 0x639   : > { %v2370_v25 = vadd.f32 %v2369_v47, %v4148_v10 }
 0x63a   : > { %v2434_v38 = vpop.f32.mrf.mxu0 }
 0x63b   : > { %v2435_v23 = vadd.f32 %v2434_v38, %v2370_v25 }
 0x63d   : > { %2478 = vst.msk [vmem:[%s4279_s29 + $0x10] sm:$0xff] %vm474_vm0, %v2435_v23 }
 0x640   : > { %v2372_v0 = vpop.f32.mrf.mxu1 }
 0x641   : > { %v2373_v12 = vadd.f32 %v2372_v0, %v4157_v5 }
 0x642   : > { %v2437_v60 = vpop.f32.mrf.mxu0 }
 0x643   : > { %v2438_v13 = vadd.f32 %v2437_v60, %v2373_v12 }
 0x645   : > { %2479 = vst.msk [vmem:[%s4279_s29 + $0x18] sm:$0xff] %vm474_vm0, %v2438_v13 }
 0x648   : > { %v2375_v50 = vpop.f32.mrf.mxu1 }
 0x649   : > { %v2376_v8 = vadd.f32 %v2375_v50, %v4166_v42 }
 0x64a   : > { %v2440_v24 = vpop.f32.mrf.mxu0 }
 0x64b   : > { %v2441_v27 = vadd.f32 %v2440_v24, %v2376_v8 }
 0x64d   : > { %2480 = vst.msk [vmem:[%s4279_s29 + $0x20] sm:$0xff] %vm474_vm0, %v2441_v27 }
 0x650   : > { %v2378_v58 = vpop.f32.mrf.mxu1 }
 0x651   : > { %v2379_v19 = vadd.f32 %v2378_v58, %v4175_v32 }
 0x652   : > { %v2443_v10 = vpop.f32.mrf.mxu0 }
 0x653   : > { %v2444_v59 = vadd.f32 %v2443_v10, %v2379_v19 }
 0x655   : > { %2481 = vst.msk [vmem:[%s4279_s29 + $0x28] sm:$0xff] %vm474_vm0, %v2444_v59 }
 0x658   : > { %v2381_v57 = vpop.f32.mrf.mxu1 }
 0x659   : > { %v2382_v5 = vadd.f32 %v2381_v57, %v4184_v54 }
 0x65a   : > { %v2446_v6 = vpop.f32.mrf.mxu0 }
 0x65b   : > { %v2447_v43 = vadd.f32 %v2446_v6, %v2382_v5 }
 0x65d   : > { %2482 = vst.msk [vmem:[%s4279_s29 + $0x30] sm:$0xff] %vm474_vm0, %v2447_v43 }
 0x660   : > { %v2384_v42 = vpop.f32.mrf.mxu1 }
 0x661   : > { %v2385_v21 = vadd.f32 %v2384_v42, %v4193_v2 }
 0x662   : > { %v2449_v44 = vpop.f32.mrf.mxu0 }
 0x663   : > { %v2450_v41 = vadd.f32 %v2449_v44, %v2385_v21 }
 0x665   : > { %2483 = vst.msk [vmem:[%s4279_s29 + $0x38] sm:$0xff] %vm474_vm0, %v2450_v41 }
 0x668   : > { %v2387_v32 = vpop.f32.mrf.mxu1 }
 0x669   : > { %v2388_v52 = vadd.f32 %v2387_v32, %v4202_v46 }
 0x66a   : > { %v2452_v33 = vpop.f32.mrf.mxu0 }
 0x66b   : > { %v2453_v56 = vadd.f32 %v2452_v33, %v2388_v52 }
 0x66d   : > { %2484 = vst.msk [vmem:[%s4279_s29 + $0x40] sm:$0xff] %vm474_vm0, %v2453_v56 }
 0x670   : > { %v2390_v54 = vpop.f32.mrf.mxu1 }
 0x671   : > { %v2391_v15 = vadd.f32 %v2390_v54, %v4211_v34 }
 0x672   : > { %v2455_v14 = vpop.f32.mrf.mxu0 }
 0x673   : > { %v2456_v31 = vadd.f32 %v2455_v14, %v2391_v15 }
 0x675   : > { %2485 = vst.msk [vmem:[%s4279_s29 + $0x48] sm:$0xff] %vm474_vm0, %v2456_v31 }
 0x678   : > { %v2393_v2 = vpop.f32.mrf.mxu1 }
 0x679   : > { %v2394_v45 = vadd.f32 %v2393_v2, %v4220_v16 }
 0x67a   : > { %v2458_v62 = vpop.f32.mrf.mxu0 }
 0x67b   : > { %v2459_v4 = vadd.f32 %v2458_v62, %v2394_v45 }
 0x67d   : > { %2486 = vst.msk [vmem:[%s4279_s29 + $0x50] sm:$0xff] %vm474_vm0, %v2459_v4 }
 0x680   : > { %v2396_v46 = vpop.f32.mrf.mxu1 }
 0x681   : > { %v2397_v1 = vadd.f32 %v2396_v46, %v4229_v18 }
 0x682   : > { %v2461_v53 = vpop.f32.mrf.mxu0 }
 0x683   : > { %v2462_v39 = vadd.f32 %v2461_v53, %v2397_v1 }
 0x685   : > { %2487 = vst.msk [vmem:[%s4279_s29 + $0x58] sm:$0xff] %vm474_vm0, %v2462_v39 }
 0x688   : > { %v2399_v34 = vpop.f32.mrf.mxu1 }
 0x689   : > { %v2400_v26 = vadd.f32 %v2399_v34, %v4238_v63 }
 0x68a   : > { %v2464_v35 = vpop.f32.mrf.mxu0 }
 0x68b   : > { %v2465_v30 = vadd.f32 %v2464_v35, %v2400_v26 }
 0x68d   : > { %2488 = vst.msk [vmem:[%s4279_s29 + $0x60] sm:$0xff] %vm474_vm0, %v2465_v30 }
 0x690   : > { %v2402_v16 = vpop.f32.mrf.mxu1 }
 0x691   : > { %v2403_v40 = vadd.f32 %v2402_v16, %v4247_v3 }
 0x692   : > { %v2467_v49 = vpop.f32.mrf.mxu0 }
 0x693   : > { %v2468_v17 = vadd.f32 %v2467_v49, %v2403_v40 }
 0x695   : > { %2489 = vst.msk [vmem:[%s4279_s29 + $0x68] sm:$0xff] %vm474_vm0, %v2468_v17 }
 0x698   : > { %v2405_v18 = vpop.f32.mrf.mxu1 }
 0x699   : > { %v2406_v11 = vadd.f32 %v2405_v18, %v4256_v37 }
 0x69a   : > { %v2470_v7 = vpop.f32.mrf.mxu0 }
 0x69b   : > { %v2471_v36 = vadd.f32 %v2470_v7, %v2406_v11 }
 0x69d   : > { %2490 = vst.msk [vmem:[%s4279_s29 + $0x70] sm:$0xff] %vm474_vm0, %v2471_v36 }
 0x6a0   : > { %v2408_v63 = vpop.f32.mrf.mxu1 }
 0x6a1   : > { %v2409_v20 = vadd.f32 %v2408_v63, %v4265_v48 }
 0x6a2   : > { %v2473_v28 = vpop.f32.mrf.mxu0 }
 0x6a3   : > { %v2474_v29 = vadd.f32 %v2473_v28, %v2409_v20 }
 0x6a5   : > { %2491 = vst.msk [vmem:[%s4279_s29 + $0x78] sm:$0xff] %vm474_vm0, %v2474_v29 }
 0x6a6 PF: > { %s24_s23 = sadd.s32 1, %s2838_s23  }
 0x6a7   : > { %p21_p4 = scmp.ge.s32.totalorder %s24_s23, 4  }
 0x6a9   :  { %23 = sbr.rel (!%p21_p4) target bundleno = 2 (0x2), region = 109 }

</bundles_post_ra>
